<compile_context>
chip_gen: v7x
topology: tpu7x:2x2x1
jax: 0.10.0
libtpu: 0.0.40
codegen_flags: <defaults>
</compile_context>

<pallas_src>
import functools

import jax
import jax.numpy as jnp
from jax.experimental import pallas as pl
from jax.experimental.pallas import tpu as pltpu


_ALIGN = 16  # bf16 sublane tile is (16, 128): keep data-row starts 16-aligned.


def _round_up(x, m):
    return ((x + m - 1) // m) * m


def _triple_conv_kernel(x_ref, w1_ref, b1_ref, w2_ref, b2_ref, w3_ref, b3_ref,
                        o_ref, p1, p2, p3, *,
                        B, H, S, D, M, WCIN, WCOUT, L1, L23):
    """Fused (conv3x3 'same' + ReLU) x 3 on a block of B images, all in VMEM.

    x_ref : (B, H, W*Cin)   input block (NHWC flattened over (W, C))
    wN_ref: (3, K_N, N_N)   banded block-Toeplitz row-weights (bf16), K/N
                            zero-padded to the slab lane widths
    bN_ref: (1, N_N)        bias tiled across W (f32, zero-padded)
    o_ref : (B, H, W*Cout)  lane-dense output block
    p1    : (R, L1)  bf16   VMEM padded layer-1 input slab
    p2,p3 : (R, L23) bf16   VMEM padded layer-2/3 input slabs
    Image b occupies slab rows [b*S + D, b*S + D + H); rows D-1 / D+M and the
    inter-image gap rows act as the 'same' zero padding along H.
    """
    cdt = p1.dtype

    if B > 1:
        # Rows of the folded batch that are conv padding (not real image rows)
        # must be written back as zeros so they pad the next layer correctly.
        row = jax.lax.broadcasted_iota(jnp.int32, (M, 1), 0)
        row_mask = ((row % S) < H).astype(jnp.float32)

    def conv_relu(p_ref, w_ref, b_ref, masked=True):
        # One MXU matmul per kernel row kh.  The row-shifted *reads* start at
        # D-1 / D / D+1 (some tile-misaligned, which is cheap; vld has
        # headroom); every *store* in this kernel stays tile-aligned.
        acc = jnp.dot(p_ref[D - 1:D - 1 + M, :], w_ref[0],
                      preferred_element_type=jnp.float32)
        acc = acc + jnp.dot(p_ref[D:D + M, :], w_ref[1],
                            preferred_element_type=jnp.float32)
        acc = acc + jnp.dot(p_ref[D + 1:D + 1 + M, :], w_ref[2],
                            preferred_element_type=jnp.float32)
        a = jnp.maximum(acc + b_ref[...], 0.0)            # f32 bias + ReLU
        if B > 1 and masked:
            a = a * row_mask
        return a

    # ---- layer-1 slab: only the halo the matmuls read is (re)zeroed ---------
    # (the data interior is fully overwritten below -> no full-slab memset).
    p1[D - 1:D + M + 1, WCIN:] = jnp.zeros((M + 2, L1 - WCIN), cdt)
    p1[D - 1:D, 0:WCIN] = jnp.zeros((1, WCIN), cdt)
    for b in range(B):
        lo = b * S + D + H                       # pad rows below image b ...
        hi = min((b + 1) * S + D, D + M + 1)     # ... up to next image / read end
        p1[lo:hi, 0:WCIN] = jnp.zeros((hi - lo, WCIN), cdt)
        p1[b * S + D:b * S + D + H, 0:WCIN] = x_ref[b].astype(cdt)
    a1 = conv_relu(p1, w1_ref, b1_ref)           # (M, L23) f32

    # ---- layer 2: intermediate stays in VMEM; one aligned full-width store --
    p2[D - 1:D, :] = jnp.zeros((1, L23), cdt)
    p2[D + M:D + M + 1, :] = jnp.zeros((1, L23), cdt)
    p2[D:D + M, :] = a1.astype(cdt)
    a2 = conv_relu(p2, w2_ref, b2_ref)

    # ---- layer 3 -------------------------------------------------------------
    p3[D - 1:D, :] = jnp.zeros((1, L23), cdt)
    p3[D + M:D + M + 1, :] = jnp.zeros((1, L23), cdt)
    p3[D:D + M, :] = a2.astype(cdt)
    a3 = conv_relu(p3, w3_ref, b3_ref, masked=False)      # (M, W*Cout) f32

    # Lane-dense per-image stores (W*Cout = 128 here -> unmasked full vst).
    for b in range(B):
        o_ref[b] = a3[b * S:b * S + H, :].astype(o_ref.dtype)


def _make_row_weights(w_hwio, w_img):
    """HWIO (3,3,Cin,Cout) -> (3, (W+2)*Cin, W*Cout) banded block-Toeplitz.

    out[kh, p*Cin+ci, x*Cout+co] = w_hwio[kh, p-x+1, ci, co] for 0 <= p-x+1 < 3,
    else 0.  Pixel p of the padded slab lives at lanes [p*Cin, (p+1)*Cin); the
    out-of-range left tap (p = -1) is simply absent (its data is zero padding).
    """
    _, _, cin, cout = w_hwio.shape
    p_idx = jnp.arange(w_img + 2)
    x_idx = jnp.arange(w_img)
    k_idx = jnp.arange(3)
    sel = (p_idx[None, None, :] ==
           x_idx[None, :, None] + k_idx[:, None, None] - 1)
    sel = sel.astype(w_hwio.dtype)                        # (3, W, W+2)
    t = jnp.einsum('kxp,hkio->hpixo', sel, w_hwio)        # (3, W+2, Cin, W, Cout)
    return t.reshape(3, (w_img + 2) * cin, w_img * cout)


def pack_triple_conv_params(params, width):
    """One-time packing of conv weights/biases for the kernel (NOT per call).

    Row-weights are zero-padded along K to the 128-rounded slab lane width and
    along N to the *next* slab's lane width (so the inter-layer store is one
    full-lane-width store), then cast to bf16.  Biases stay f32.
    """
    (w1, b1), (w2, b2), (w3, b3) = params
    cin = w1.shape[2]
    cout = b1.shape[0]
    l1 = _round_up((width + 2) * cin, 128)    # layer-1 slab lane width / K1
    l23 = _round_up((width + 2) * cout, 128)  # layer-2/3 slab lane width / K2,K3
    n_out = width * cout

    def pack_w(w_hwio, k_pad, n_pad):
        t = _make_row_weights(w_hwio, width)
        t = jnp.pad(t, ((0, 0), (0, k_pad - t.shape[1]), (0, n_pad - t.shape[2])))
        return t.astype(jnp.bfloat16)

    def pack_b(b, n_pad):
        bt = jnp.pad(jnp.tile(b, width), (0, n_pad - width * b.shape[0]))
        return bt[None, :].astype(jnp.float32)

    return ((pack_w(w1, l1, l23), pack_b(b1, l23)),
            (pack_w(w2, l23, l23), pack_b(b2, l23)),
            (pack_w(w3, l23, n_out), pack_b(b3, n_out)))


def _replicated_spec(shape):
    # Grid-invariant operand (weights / bias): fetched once, same block for
    # every grid step.
    zeros = (0,) * len(shape)
    return pl.BlockSpec(shape, lambda i: zeros)


def init_triple_conv_params(key, in_channels, out_channels):
    """Deterministic params; mirrors PyTorch Conv2d default init."""
    params = []
    cin = in_channels
    for _ in range(3):
        key, kw_, kb_ = jax.random.split(key, 3)
        fan_in = cin * 3 * 3
        bound = 1.0 / jnp.sqrt(float(fan_in))
        # PyTorch weight layout is OIHW; store HWIO for the NHWC formulation.
        w_oihw = jax.random.uniform(kw_, (out_channels, cin, 3, 3),
                                    jnp.float32, -bound, bound)
        w_hwio = jnp.transpose(w_oihw, (2, 3, 1, 0))
        bias = jax.random.uniform(kb_, (out_channels,), jnp.float32,
                                  -bound, bound)
        params.append((w_hwio, bias))
        cin = out_channels
    return params


@jax.jit
def triple_conv_forward(x_nchw, packed_params):
    """Matches TripleConv.forward: NCHW in, NCHW out.

    packed_params comes from pack_triple_conv_params and is tied to this W.
    """
    n, cin, h, w = x_nchw.shape
    (w1p, b1p), (w2p, b2p), (w3p, b3p) = packed_params
    cout = b3p.shape[1] // w
    l1, l23 = w1p.shape[1], w2p.shape[1]
    wcin, wcout = w * cin, w * cout

    # Grid: 2 "parallel" steps when the batch splits evenly (keeps both v7x
    # TensorCores busy); the images of each step are folded into the matmul M
    # dimension instead of extra grid steps.
    g = 2 if (n >= 2 and n % 2 == 0) else 1
    bpg = n // g                                   # images per grid step
    d = _ALIGN                                     # first data row (tile-aligned)
    s = _round_up(h + 1, _ALIGN)                   # per-image row stride in slab
    m = (bpg - 1) * s + h                          # matmul M rows per grid step
    r = bpg * s + _ALIGN                           # slab rows (covers read halo)

    # NCHW -> NHWC -> lane-dense (N, H, W*Cin) slab (same bytes, free reshape).
    x_slab = jnp.transpose(x_nchw, (0, 2, 3, 1)).reshape(n, h, wcin)

    kernel = functools.partial(
        _triple_conv_kernel, B=bpg, H=h, S=s, D=d, M=m,
        WCIN=wcin, WCOUT=wcout, L1=l1, L23=l23)

    out_slab = pl.pallas_call(
        kernel,
        out_shape=jax.ShapeDtypeStruct((n, h, wcout), x_nchw.dtype),
        grid=(g,),
        in_specs=[
            pl.BlockSpec((bpg, h, wcin), lambda i: (i, 0, 0)),
            _replicated_spec(w1p.shape), _replicated_spec(b1p.shape),
            _replicated_spec(w2p.shape), _replicated_spec(b2p.shape),
            _replicated_spec(w3p.shape), _replicated_spec(b3p.shape),
        ],
        out_specs=pl.BlockSpec((bpg, h, wcout), lambda i: (i, 0, 0)),
        scratch_shapes=[
            pltpu.VMEM((r, l1), jnp.bfloat16),
            pltpu.VMEM((r, l23), jnp.bfloat16),
            pltpu.VMEM((r, l23), jnp.bfloat16),
        ],
        compiler_params=pltpu.CompilerParams(
            dimension_semantics=("parallel",)),
    )(x_slab, w1p, b1p, w2p, b2p, w3p, b3p)

    # (N, H, W*Cout) -> NHWC -> NCHW (pure layout plumbing).
    return jnp.transpose(out_slab.reshape(n, h, w, cout), (0, 3, 1, 2))


def _reference_triple_conv(x_nchw, params):
    """Pure-JAX f32 reference (lax conv) for a correctness check."""
    x = jnp.transpose(x_nchw, (0, 2, 3, 1))
    for w_hwio, b in params:
        y = jax.lax.conv_general_dilated(
            x, w_hwio, window_strides=(1, 1), padding="SAME",
            dimension_numbers=("NHWC", "HWIO", "NHWC"))
        x = jnp.maximum(y + b[None, None, None, :], 0.0)
    return jnp.transpose(x, (0, 3, 1, 2))


if __name__ == "__main__":
    key = jax.random.PRNGKey(0)
    k_x, k_p = jax.random.split(key)

    # Small shapes consistent with the module: N=2, Cin=4, H=W=16, Cout=8.
    in_channels, out_channels = 4, 8
    x = jax.random.normal(k_x, (2, in_channels, 16, 16), jnp.float32)
    params = init_triple_conv_params(k_p, in_channels, out_channels)

    # Weight packing happens ONCE, outside the jitted forward (hot path).
    packed = pack_triple_conv_params(params, width=x.shape[-1])

    out = jax.block_until_ready(triple_conv_forward(x, packed))

    ref = _reference_triple_conv(x, params)
    assert out.shape == (2, out_channels, 16, 16)
    # bf16 weights/activations (f32 accumulation) -> loosened tolerance.
    assert jnp.allclose(out, ref, atol=5e-2, rtol=5e-2), float(
        jnp.max(jnp.abs(out - ref)))

    print("KERNEL_OK")
</pallas_src>

<mosaic_0001>
module attributes {stable_mosaic.version = 11 : i64} {
  func.func @_triple_conv_kernel(%arg0: i32, %arg1: memref<1x16x64xf32, #tpu.memory_space<vmem>>, %arg2: memref<3x128x256xbf16, #tpu.memory_space<vmem>>, %arg3: memref<1x256xf32, #tpu.memory_space<vmem>>, %arg4: memref<3x256x256xbf16, #tpu.memory_space<vmem>>, %arg5: memref<1x256xf32, #tpu.memory_space<vmem>>, %arg6: memref<3x256x128xbf16, #tpu.memory_space<vmem>>, %arg7: memref<1x128xf32, #tpu.memory_space<vmem>>, %arg8: memref<1x16x128xf32, #tpu.memory_space<vmem>>, %arg9: memref<48x128xbf16, #tpu.memory_space<vmem>>, %arg10: memref<48x256xbf16, #tpu.memory_space<vmem>>, %arg11: memref<48x256xbf16, #tpu.memory_space<vmem>>) attributes {dimension_semantics = [#tpu.dimension_semantics<parallel>], iteration_bounds = array<i64: 2>, scalar_prefetch = 0 : i64, scratch_operands = 3 : i64, tpu.core_type = #tpu.core_type<tc>, window_params = [{transform_indices = @transform_0, window_bounds = array<i64: 1, 16, 64>}, {pipeline_mode = #tpu.pipeline_mode<synchronous>, transform_indices = @transform_1, window_bounds = array<i64: 3, 128, 256>}, {pipeline_mode = #tpu.pipeline_mode<synchronous>, transform_indices = @transform_2, window_bounds = array<i64: 1, 256>}, {pipeline_mode = #tpu.pipeline_mode<synchronous>, transform_indices = @transform_3, window_bounds = array<i64: 3, 256, 256>}, {pipeline_mode = #tpu.pipeline_mode<synchronous>, transform_indices = @transform_4, window_bounds = array<i64: 1, 256>}, {pipeline_mode = #tpu.pipeline_mode<synchronous>, transform_indices = @transform_5, window_bounds = array<i64: 3, 256, 128>}, {pipeline_mode = #tpu.pipeline_mode<synchronous>, transform_indices = @transform_6, window_bounds = array<i64: 1, 128>}, {transform_indices = @transform_7, window_bounds = array<i64: 1, 16, 128>}]} {
    %cst = arith.constant 0.000000e+00 : bf16
    %0 = vector.broadcast %cst : bf16 to vector<18x64xbf16>
    %c15 = arith.constant 15 : index
    %c64 = arith.constant 64 : index
    %1 = vector.load %arg9[%c15, %c64] : memref<48x128xbf16, #tpu.memory_space<vmem>>, vector<18x64xbf16>
    tpu.vector_store %arg9[%c15, %c64], %0 {strides = array<i32>} : memref<48x128xbf16, #tpu.memory_space<vmem>>, vector<18x64xbf16>,
    %cst_0 = arith.constant 0.000000e+00 : bf16
    %2 = vector.broadcast %cst_0 : bf16 to vector<1x64xbf16>
    %c15_1 = arith.constant 15 : index
    %c0 = arith.constant 0 : index
    %3 = vector.load %arg9[%c15_1, %c0] : memref<48x128xbf16, #tpu.memory_space<vmem>>, vector<1x64xbf16>
    tpu.vector_store %arg9[%c15_1, %c0], %2 {strides = array<i32>} : memref<48x128xbf16, #tpu.memory_space<vmem>>, vector<1x64xbf16>,
    %cst_2 = arith.constant 0.000000e+00 : bf16
    %4 = vector.broadcast %cst_2 : bf16 to vector<1x64xbf16>
    %c32 = arith.constant 32 : index
    %c0_3 = arith.constant 0 : index
    %5 = vector.load %arg9[%c32, %c0_3] : memref<48x128xbf16, #tpu.memory_space<vmem>>, vector<1x64xbf16>
    tpu.vector_store %arg9[%c32, %c0_3], %4 {strides = array<i32>} : memref<48x128xbf16, #tpu.memory_space<vmem>>, vector<1x64xbf16>,
    %c0_4 = arith.constant 0 : index
    %c0_5 = arith.constant 0 : index
    %c0_6 = arith.constant 0 : index
    %6 = vector.load %arg1[%c0_4, %c0_5, %c0_6] : memref<1x16x64xf32, #tpu.memory_space<vmem>>, vector<1x16x64xf32>
    %7 = vector.shape_cast %6 : vector<1x16x64xf32> to vector<16x64xf32>
    %8 = arith.truncf %7 : vector<16x64xf32> to vector<16x64xbf16>
    %c16 = arith.constant 16 : index
    %c0_7 = arith.constant 0 : index
    %9 = vector.load %arg9[%c16, %c0_7] : memref<48x128xbf16, #tpu.memory_space<vmem>>, vector<16x64xbf16>
    tpu.vector_store %arg9[%c16, %c0_7], %8 {strides = array<i32>} : memref<48x128xbf16, #tpu.memory_space<vmem>>, vector<16x64xbf16>,
    %c15_8 = arith.constant 15 : index
    %c0_9 = arith.constant 0 : index
    %10 = vector.load %arg9[%c15_8, %c0_9] : memref<48x128xbf16, #tpu.memory_space<vmem>>, vector<16x128xbf16>
    %c0_10 = arith.constant 0 : index
    %c0_11 = arith.constant 0 : index
    %c0_12 = arith.constant 0 : index
    %11 = vector.load %arg2[%c0_10, %c0_11, %c0_12] : memref<3x128x256xbf16, #tpu.memory_space<vmem>>, vector<1x128x256xbf16>
    %12 = vector.shape_cast %11 : vector<1x128x256xbf16> to vector<128x256xbf16>
    %cst_13 = arith.constant dense<0.000000e+00> : vector<16x256xf32>
    %13 = tpu.matmul %10, %12, %cst_13 {dimension_numbers = #tpu.dot_dimension_numbers<[1], [0], [0], [1], [0, 0, 1, 1], [], []>} : vector<16x128xbf16>, vector<128x256xbf16>, vector<16x256xf32> -> vector<16x256xf32>
    %c16_14 = arith.constant 16 : index
    %c0_15 = arith.constant 0 : index
    %14 = vector.load %arg9[%c16_14, %c0_15] : memref<48x128xbf16, #tpu.memory_space<vmem>>, vector<16x128xbf16>
    %c1 = arith.constant 1 : index
    %c0_16 = arith.constant 0 : index
    %c0_17 = arith.constant 0 : index
    %15 = vector.load %arg2[%c1, %c0_16, %c0_17] : memref<3x128x256xbf16, #tpu.memory_space<vmem>>, vector<1x128x256xbf16>
    %16 = vector.shape_cast %15 : vector<1x128x256xbf16> to vector<128x256xbf16>
    %cst_18 = arith.constant dense<0.000000e+00> : vector<16x256xf32>
    %17 = tpu.matmul %14, %16, %cst_18 {dimension_numbers = #tpu.dot_dimension_numbers<[1], [0], [0], [1], [0, 0, 1, 1], [], []>} : vector<16x128xbf16>, vector<128x256xbf16>, vector<16x256xf32> -> vector<16x256xf32>
    %18 = arith.addf %13, %17 : vector<16x256xf32>
    %c17 = arith.constant 17 : index
    %c0_19 = arith.constant 0 : index
    %19 = vector.load %arg9[%c17, %c0_19] : memref<48x128xbf16, #tpu.memory_space<vmem>>, vector<16x128xbf16>
    %c2 = arith.constant 2 : index
    %c0_20 = arith.constant 0 : index
    %c0_21 = arith.constant 0 : index
    %20 = vector.load %arg2[%c2, %c0_20, %c0_21] : memref<3x128x256xbf16, #tpu.memory_space<vmem>>, vector<1x128x256xbf16>
    %21 = vector.shape_cast %20 : vector<1x128x256xbf16> to vector<128x256xbf16>
    %cst_22 = arith.constant dense<0.000000e+00> : vector<16x256xf32>
    %22 = tpu.matmul %19, %21, %cst_22 {dimension_numbers = #tpu.dot_dimension_numbers<[1], [0], [0], [1], [0, 0, 1, 1], [], []>} : vector<16x128xbf16>, vector<128x256xbf16>, vector<16x256xf32> -> vector<16x256xf32>
    %23 = arith.addf %18, %22 : vector<16x256xf32>
    %c0_23 = arith.constant 0 : index
    %c0_24 = arith.constant 0 : index
    %24 = vector.load %arg3[%c0_23, %c0_24] : memref<1x256xf32, #tpu.memory_space<vmem>>, vector<1x256xf32>
    %25 = vector.broadcast %24 : vector<1x256xf32> to vector<16x256xf32>
    %26 = arith.addf %23, %25 : vector<16x256xf32>
    %cst_25 = arith.constant 0.000000e+00 : f32
    %27 = vector.broadcast %cst_25 : f32 to vector<16x256xf32>
    %28 = arith.maximumf %26, %27 : vector<16x256xf32>
    %cst_26 = arith.constant 0.000000e+00 : bf16
    %29 = vector.broadcast %cst_26 : bf16 to vector<1x256xbf16>
    %c15_27 = arith.constant 15 : index
    %c0_28 = arith.constant 0 : index
    %30 = vector.load %arg10[%c15_27, %c0_28] : memref<48x256xbf16, #tpu.memory_space<vmem>>, vector<1x256xbf16>
    tpu.vector_store %arg10[%c15_27, %c0_28], %29 {strides = array<i32>} : memref<48x256xbf16, #tpu.memory_space<vmem>>, vector<1x256xbf16>,
    %cst_29 = arith.constant 0.000000e+00 : bf16
    %31 = vector.broadcast %cst_29 : bf16 to vector<1x256xbf16>
    %c32_30 = arith.constant 32 : index
    %c0_31 = arith.constant 0 : index
    %32 = vector.load %arg10[%c32_30, %c0_31] : memref<48x256xbf16, #tpu.memory_space<vmem>>, vector<1x256xbf16>
    tpu.vector_store %arg10[%c32_30, %c0_31], %31 {strides = array<i32>} : memref<48x256xbf16, #tpu.memory_space<vmem>>, vector<1x256xbf16>,
    %33 = arith.truncf %28 : vector<16x256xf32> to vector<16x256xbf16>
    %c16_32 = arith.constant 16 : index
    %c0_33 = arith.constant 0 : index
    %34 = vector.load %arg10[%c16_32, %c0_33] : memref<48x256xbf16, #tpu.memory_space<vmem>>, vector<16x256xbf16>
    tpu.vector_store %arg10[%c16_32, %c0_33], %33 {strides = array<i32>} : memref<48x256xbf16, #tpu.memory_space<vmem>>, vector<16x256xbf16>,
    %c15_34 = arith.constant 15 : index
    %c0_35 = arith.constant 0 : index
    %35 = vector.load %arg10[%c15_34, %c0_35] : memref<48x256xbf16, #tpu.memory_space<vmem>>, vector<16x256xbf16>
    %c0_36 = arith.constant 0 : index
    %c0_37 = arith.constant 0 : index
    %c0_38 = arith.constant 0 : index
    %36 = vector.load %arg4[%c0_36, %c0_37, %c0_38] : memref<3x256x256xbf16, #tpu.memory_space<vmem>>, vector<1x256x256xbf16>
    %37 = vector.shape_cast %36 : vector<1x256x256xbf16> to vector<256x256xbf16>
    %cst_39 = arith.constant dense<0.000000e+00> : vector<16x256xf32>
    %38 = tpu.matmul %35, %37, %cst_39 {dimension_numbers = #tpu.dot_dimension_numbers<[1], [0], [0], [1], [0, 0, 1, 1], [], []>} : vector<16x256xbf16>, vector<256x256xbf16>, vector<16x256xf32> -> vector<16x256xf32>
    %c16_40 = arith.constant 16 : index
    %c0_41 = arith.constant 0 : index
    %39 = vector.load %arg10[%c16_40, %c0_41] : memref<48x256xbf16, #tpu.memory_space<vmem>>, vector<16x256xbf16>
    %c1_42 = arith.constant 1 : index
    %c0_43 = arith.constant 0 : index
    %c0_44 = arith.constant 0 : index
    %40 = vector.load %arg4[%c1_42, %c0_43, %c0_44] : memref<3x256x256xbf16, #tpu.memory_space<vmem>>, vector<1x256x256xbf16>
    %41 = vector.shape_cast %40 : vector<1x256x256xbf16> to vector<256x256xbf16>
    %cst_45 = arith.constant dense<0.000000e+00> : vector<16x256xf32>
    %42 = tpu.matmul %39, %41, %cst_45 {dimension_numbers = #tpu.dot_dimension_numbers<[1], [0], [0], [1], [0, 0, 1, 1], [], []>} : vector<16x256xbf16>, vector<256x256xbf16>, vector<16x256xf32> -> vector<16x256xf32>
    %43 = arith.addf %38, %42 : vector<16x256xf32>
    %c17_46 = arith.constant 17 : index
    %c0_47 = arith.constant 0 : index
    %44 = vector.load %arg10[%c17_46, %c0_47] : memref<48x256xbf16, #tpu.memory_space<vmem>>, vector<16x256xbf16>
    %c2_48 = arith.constant 2 : index
    %c0_49 = arith.constant 0 : index
    %c0_50 = arith.constant 0 : index
    %45 = vector.load %arg4[%c2_48, %c0_49, %c0_50] : memref<3x256x256xbf16, #tpu.memory_space<vmem>>, vector<1x256x256xbf16>
    %46 = vector.shape_cast %45 : vector<1x256x256xbf16> to vector<256x256xbf16>
    %cst_51 = arith.constant dense<0.000000e+00> : vector<16x256xf32>
    %47 = tpu.matmul %44, %46, %cst_51 {dimension_numbers = #tpu.dot_dimension_numbers<[1], [0], [0], [1], [0, 0, 1, 1], [], []>} : vector<16x256xbf16>, vector<256x256xbf16>, vector<16x256xf32> -> vector<16x256xf32>
    %48 = arith.addf %43, %47 : vector<16x256xf32>
    %c0_52 = arith.constant 0 : index
    %c0_53 = arith.constant 0 : index
    %49 = vector.load %arg5[%c0_52, %c0_53] : memref<1x256xf32, #tpu.memory_space<vmem>>, vector<1x256xf32>
    %50 = vector.broadcast %49 : vector<1x256xf32> to vector<16x256xf32>
    %51 = arith.addf %48, %50 : vector<16x256xf32>
    %cst_54 = arith.constant 0.000000e+00 : f32
    %52 = vector.broadcast %cst_54 : f32 to vector<16x256xf32>
    %53 = arith.maximumf %51, %52 : vector<16x256xf32>
    %cst_55 = arith.constant 0.000000e+00 : bf16
    %54 = vector.broadcast %cst_55 : bf16 to vector<1x256xbf16>
    %c15_56 = arith.constant 15 : index
    %c0_57 = arith.constant 0 : index
    %55 = vector.load %arg11[%c15_56, %c0_57] : memref<48x256xbf16, #tpu.memory_space<vmem>>, vector<1x256xbf16>
    tpu.vector_store %arg11[%c15_56, %c0_57], %54 {strides = array<i32>} : memref<48x256xbf16, #tpu.memory_space<vmem>>, vector<1x256xbf16>,
    %cst_58 = arith.constant 0.000000e+00 : bf16
    %56 = vector.broadcast %cst_58 : bf16 to vector<1x256xbf16>
    %c32_59 = arith.constant 32 : index
    %c0_60 = arith.constant 0 : index
    %57 = vector.load %arg11[%c32_59, %c0_60] : memref<48x256xbf16, #tpu.memory_space<vmem>>, vector<1x256xbf16>
    tpu.vector_store %arg11[%c32_59, %c0_60], %56 {strides = array<i32>} : memref<48x256xbf16, #tpu.memory_space<vmem>>, vector<1x256xbf16>,
    %58 = arith.truncf %53 : vector<16x256xf32> to vector<16x256xbf16>
    %c16_61 = arith.constant 16 : index
    %c0_62 = arith.constant 0 : index
    %59 = vector.load %arg11[%c16_61, %c0_62] : memref<48x256xbf16, #tpu.memory_space<vmem>>, vector<16x256xbf16>
    tpu.vector_store %arg11[%c16_61, %c0_62], %58 {strides = array<i32>} : memref<48x256xbf16, #tpu.memory_space<vmem>>, vector<16x256xbf16>,
    %c15_63 = arith.constant 15 : index
    %c0_64 = arith.constant 0 : index
    %60 = vector.load %arg11[%c15_63, %c0_64] : memref<48x256xbf16, #tpu.memory_space<vmem>>, vector<16x256xbf16>
    %c0_65 = arith.constant 0 : index
    %c0_66 = arith.constant 0 : index
    %c0_67 = arith.constant 0 : index
    %61 = vector.load %arg6[%c0_65, %c0_66, %c0_67] : memref<3x256x128xbf16, #tpu.memory_space<vmem>>, vector<1x256x128xbf16>
    %62 = vector.shape_cast %61 : vector<1x256x128xbf16> to vector<256x128xbf16>
    %cst_68 = arith.constant dense<0.000000e+00> : vector<16x128xf32>
    %63 = tpu.matmul %60, %62, %cst_68 {dimension_numbers = #tpu.dot_dimension_numbers<[1], [0], [0], [1], [0, 0, 1, 1], [], []>} : vector<16x256xbf16>, vector<256x128xbf16>, vector<16x128xf32> -> vector<16x128xf32>
    %c16_69 = arith.constant 16 : index
    %c0_70 = arith.constant 0 : index
    %64 = vector.load %arg11[%c16_69, %c0_70] : memref<48x256xbf16, #tpu.memory_space<vmem>>, vector<16x256xbf16>
    %c1_71 = arith.constant 1 : index
    %c0_72 = arith.constant 0 : index
    %c0_73 = arith.constant 0 : index
    %65 = vector.load %arg6[%c1_71, %c0_72, %c0_73] : memref<3x256x128xbf16, #tpu.memory_space<vmem>>, vector<1x256x128xbf16>
    %66 = vector.shape_cast %65 : vector<1x256x128xbf16> to vector<256x128xbf16>
    %cst_74 = arith.constant dense<0.000000e+00> : vector<16x128xf32>
    %67 = tpu.matmul %64, %66, %cst_74 {dimension_numbers = #tpu.dot_dimension_numbers<[1], [0], [0], [1], [0, 0, 1, 1], [], []>} : vector<16x256xbf16>, vector<256x128xbf16>, vector<16x128xf32> -> vector<16x128xf32>
    %68 = arith.addf %63, %67 : vector<16x128xf32>
    %c17_75 = arith.constant 17 : index
    %c0_76 = arith.constant 0 : index
    %69 = vector.load %arg11[%c17_75, %c0_76] : memref<48x256xbf16, #tpu.memory_space<vmem>>, vector<16x256xbf16>
    %c2_77 = arith.constant 2 : index
    %c0_78 = arith.constant 0 : index
    %c0_79 = arith.constant 0 : index
    %70 = vector.load %arg6[%c2_77, %c0_78, %c0_79] : memref<3x256x128xbf16, #tpu.memory_space<vmem>>, vector<1x256x128xbf16>
    %71 = vector.shape_cast %70 : vector<1x256x128xbf16> to vector<256x128xbf16>
    %cst_80 = arith.constant dense<0.000000e+00> : vector<16x128xf32>
    %72 = tpu.matmul %69, %71, %cst_80 {dimension_numbers = #tpu.dot_dimension_numbers<[1], [0], [0], [1], [0, 0, 1, 1], [], []>} : vector<16x256xbf16>, vector<256x128xbf16>, vector<16x128xf32> -> vector<16x128xf32>
    %73 = arith.addf %68, %72 : vector<16x128xf32>
    %c0_81 = arith.constant 0 : index
    %c0_82 = arith.constant 0 : index
    %74 = vector.load %arg7[%c0_81, %c0_82] : memref<1x128xf32, #tpu.memory_space<vmem>>, vector<1x128xf32>
    %75 = vector.broadcast %74 : vector<1x128xf32> to vector<16x128xf32>
    %76 = arith.addf %73, %75 : vector<16x128xf32>
    %cst_83 = arith.constant 0.000000e+00 : f32
    %77 = vector.broadcast %cst_83 : f32 to vector<16x128xf32>
    %78 = arith.maximumf %76, %77 : vector<16x128xf32>
    %c0_84 = arith.constant 0 : index
    %c0_85 = arith.constant 0 : index
    %c0_86 = arith.constant 0 : index
    %79 = vector.load %arg8[%c0_84, %c0_85, %c0_86] : memref<1x16x128xf32, #tpu.memory_space<vmem>>, vector<1x16x128xf32>
    %80 = vector.shape_cast %79 : vector<1x16x128xf32> to vector<16x128xf32>
    %81 = vector.shape_cast %78 : vector<16x128xf32> to vector<1x16x128xf32>
    tpu.vector_store %arg8[%c0_84, %c0_85, %c0_86], %81 {strides = array<i32>} : memref<1x16x128xf32, #tpu.memory_space<vmem>>, vector<1x16x128xf32>,
    return
  }
  func.func @transform_0(%arg0: i32) -> (i32, i32, i32) {
    %c0_i32 = arith.constant 0 : i32
    %c0_i32_0 = arith.constant 0 : i32
    %c0_i32_1 = arith.constant 0 : i32
    return %arg0, %c0_i32, %c0_i32_0 : i32, i32, i32
  }
  func.func @transform_1(%arg0: i32) -> (i32, i32, i32) {
    %c0_i32 = arith.constant 0 : i32
    %c0_i32_0 = arith.constant 0 : i32
    %c0_i32_1 = arith.constant 0 : i32
    %c0_i32_2 = arith.constant 0 : i32
    return %c0_i32, %c0_i32_0, %c0_i32_1 : i32, i32, i32
  }
  func.func @transform_2(%arg0: i32) -> (i32, i32) {
    %c0_i32 = arith.constant 0 : i32
    %c0_i32_0 = arith.constant 0 : i32
    %c0_i32_1 = arith.constant 0 : i32
    return %c0_i32, %c0_i32_0 : i32, i32
  }
  func.func @transform_3(%arg0: i32) -> (i32, i32, i32) {
    %c0_i32 = arith.constant 0 : i32
    %c0_i32_0 = arith.constant 0 : i32
    %c0_i32_1 = arith.constant 0 : i32
    %c0_i32_2 = arith.constant 0 : i32
    return %c0_i32, %c0_i32_0, %c0_i32_1 : i32, i32, i32
  }
  func.func @transform_4(%arg0: i32) -> (i32, i32) {
    %c0_i32 = arith.constant 0 : i32
    %c0_i32_0 = arith.constant 0 : i32
    %c0_i32_1 = arith.constant 0 : i32
    return %c0_i32, %c0_i32_0 : i32, i32
  }
  func.func @transform_5(%arg0: i32) -> (i32, i32, i32) {
    %c0_i32 = arith.constant 0 : i32
    %c0_i32_0 = arith.constant 0 : i32
    %c0_i32_1 = arith.constant 0 : i32
    %c0_i32_2 = arith.constant 0 : i32
    return %c0_i32, %c0_i32_0, %c0_i32_1 : i32, i32, i32
  }
  func.func @transform_6(%arg0: i32) -> (i32, i32) {
    %c0_i32 = arith.constant 0 : i32
    %c0_i32_0 = arith.constant 0 : i32
    %c0_i32_1 = arith.constant 0 : i32
    return %c0_i32, %c0_i32_0 : i32, i32
  }
  func.func @transform_7(%arg0: i32) -> (i32, i32, i32) {
    %c0_i32 = arith.constant 0 : i32
    %c0_i32_0 = arith.constant 0 : i32
    %c0_i32_1 = arith.constant 0 : i32
    return %arg0, %c0_i32, %c0_i32_0 : i32, i32, i32
  }
}

</mosaic_0001>

<bundles_post_ra>
// kernel: triple_conv_forward.1
= control target key start
LH: loop header
LB: loop body
LE: loop exit
PB: predicated region body
PF: predicated region fallthrough
CT: control target
= control target key end

     0   :  { %12 = vsyncpa [#allocation6], 0  ;;  %s3401_s0 = inlined_call_operand.vmem [shape: f32[2,16,64], index: 0, kind: input, shape index: {}]   ;;  %s3402_s1 = inlined_call_operand.vmem [shape: bf16[3,128,256], index: 1, kind: input, shape index: {}]   ;;  %s3403_s2 = inlined_call_operand.vmem [shape: f32[1,256], index: 2, kind: input, shape index: {}]   ;;  %s3404_s3 = inlined_call_operand.hbm [shape: bf16[3,256,256], index: 3, kind: input, shape index: {}]   ;;  %s3405_s4 = inlined_call_operand.vmem [shape: f32[1,256], index: 4, kind: input, shape index: {}]   ;;  %s3406_s5 = inlined_call_operand.hbm [shape: bf16[3,256,128], index: 5, kind: input, shape index: {}]   ;;  %s3407_s6 = inlined_call_operand.vmem [shape: f32[1,128], index: 6, kind: input, shape index: {}]   ;;  %s3408_s7 = inlined_call_operand.vmem [shape: f32[2,16,128], index: 7, kind: output, shape index: {}]  }
   0x1   :  { %13 = vsyncpa [#allocation8], 0  ;;  %s3042_s24 = smov 0  }
   0x2 LB: > { %s2995_s25 = smov [#allocation5]   ;;  %s3048_s27 = sadd.s32 4294967295, %s2993_s24   ;;  %s2993_s24 = sphi %s3042_s24, %s19_s24  }
   0x3   : > { %s220_s26 = sshll.u32 %s2995_s25, 4  ;;  %p2303_p0 = scmp.ge.s32.totalorder %s2993_s24, 1  ;;  %s221_s26 = int_to_ptr.vmem [resolvable:$true] %s220_s26 }
   0x4   : > { %p202_p1 = scmp.lt.s32.totalorder %s2993_s24, 3  ;;  %p3409_p3 = scmp.eq.s32.totalorder %s3048_s27, 0 }
   0x5   : > { %s2996_s29 = smov [#allocation7]   ;;  %s2923_s11 = scalar_lea.hbm %s3404_s3, 12288 }
   0x6   : > { %p3052_p2 = pnand %p2303_p0, %p202_p1  ;;  %s236_s30 = sshll.u32 %s2996_s29, 4  ;;  %s3065_s30 = int_to_ptr.vmem [resolvable:$true] %s236_s30 }
   0x7   : > { %p2924_p6 = scmp.ne.s32.totalorder %s3404_s3, %s2923_s11  ;;  %p2930_p10 = scmp.lt.u32.totalorder %s2923_s11, %s3404_s3 }
   0x8   : > { %s3411_s28 = scalar_select %p3052_p2, 1, 0 }
   0x9   : > { %p2633_p4 = pneg %p3052_p2 }
   0xb   : > { %p3061_p5 = pnand %p3409_p3, %p2633_p4 }
   0xd   : > { %p2925_p7 = pneg %p3061_p5 }
   0xf   : > { %p2926_p8 = pnand %p2925_p7, %p2924_p6 }
  0x11   : > { %p2927_p9 = pneg %p2926_p8 }
  0x13   : > { %p2932_p11 = pnand %p2930_p10, %p2927_p9 }
  0x15   : > { %2935 = shalt.err (!%p2932_p11)
}
  0x16   : > { %s2936_s16 = scalar_lea.vmem %s221_s26, 12288  ;;  %p2944_p1 = scmp.lt.s32.totalorder %s221_s26, %s221_s26 }
  0x17   : > { %p2937_p12 = scmp.ne.s32.totalorder %s221_s26, %s2936_s16  ;;  %p2945_p4 = scmp.lt.s32.totalorder %s2936_s16, %s2936_s16 }
  0x19   : > { %p2939_p13 = pnand %p2937_p12, %p2925_p7  ;;  %p2946_p3 = por %p2945_p4, %p2944_p1 }
  0x1b   : > { %p2940_p0 = pneg %p2939_p13 }
  0x1d   : > { %p2947_p2 = pnand %p2946_p3, %p2940_p0 }
  0x1f   : > { %2950 = shalt.err (!%p2947_p2)
}
  0x20   : > { %s2997_s17 = smov 128   ;;  %s2998_s18 = smov 8  }
  0x21   : > { %2636 = dma.hbm_to_vmem [thread:$0]  (!%p3061_p5), %s3404_s3, 12288, %s221_s26, [#allocation6], %s2997_s17, %s2997_s17, %s2998_s18  }
  0x22   : > { %s2951_s23 = scalar_lea.hbm %s3406_s5, 6144 }
  0x23   : > { %p2952_p6 = scmp.ne.s32.totalorder %s3406_s5, %s2951_s23  ;;  %p2958_p8 = scmp.lt.u32.totalorder %s2951_s23, %s3406_s5 }
  0x25   : > { %p2954_p2 = pnand %p2952_p6, %p2925_p7 }
  0x27   : > { %p2955_p3 = pneg %p2954_p2 }
  0x29   : > { %p2960_p9 = pnand %p2958_p8, %p2955_p3 }
  0x2b   : > { %2963 = shalt.err (!%p2960_p9)
}
  0x2c   : > { %s2964_s26 = scalar_lea.vmem %s3065_s30, 6144  ;;  %p2972_p13 = scmp.lt.s32.totalorder %s3065_s30, %s3065_s30 }
  0x2d   : > { %p2965_p10 = scmp.ne.s32.totalorder %s3065_s30, %s2964_s26  ;;  %p2973_p0 = scmp.lt.s32.totalorder %s2964_s26, %s2964_s26 }
  0x2f   : > { %p2967_p11 = pnand %p2965_p10, %p2925_p7  ;;  %p2974_p1 = por %p2973_p0, %p2972_p13 }
  0x31   : > { %p2968_p12 = pneg %p2967_p11 }
  0x33   : > { %p2975_p4 = pnand %p2974_p1, %p2968_p12 }
  0x35   : > { %2978 = shalt.err (!%p2975_p4)
}
  0x36   : > { %s2999_s11 = smov 64   ;;  %s3000_s12 = smov 4  }
  0x37   : > { %2639 = dma.hbm_to_vmem [thread:$0]  (!%p3061_p5), %s3406_s5, 6144, %s3065_s30, [#allocation8], %s2999_s11, %s2999_s11, %s3000_s12  }
  0x38   : > { %p3413_p6 = scmp.ne.s32.totalorder %s3411_s28, 0 }
  0x39   : > { %p3414_p7 = scmp.eq.s32.totalorder (!%p3413_p6), %s3048_s27, 0 }
  0x3a   : > { %263 = sbr.rel (%p3413_p6) target bundleno = 1028 (0x404), region = 48 }
  0x41   : > { %2984 = dma.done.wait (%p3414_p7), [#allocation6], 12288   ;;  %p3415_p2 = pmov %p3414_p7 }
  0x43   : > { %2986 = vsyncadd (%p3415_p2), [#allocation6], 4294955008  ;;  %p3416_p3 = pmov %p3415_p2 }
  0x44   : > { %p3417_p8 = pmov %p3415_p2 }
  0x45   : > { %2988 = dma.done.wait (%p3416_p3), [#allocation8], 6144  }
  0x46   : > { %2990 = vsyncadd (%p3417_p8), [#allocation8], 4294961152  ;;  %vm316_vm0 = vcmask 1048064   ;;  %v3001_v0 = vmov 0   ;;  %p299_p5 = scmp.lt.s32.totalorder %s3048_s27, 1  ;;  %vm337_vm1 = vcmask 523264  }
  0x47   : > { %317 = vst.msk [vmem:[#allocation2 + $0x8] sm:$0xff] %vm316_vm0, %v3001_v0  ;;  %486 = vmatprep.mubr.bf16.mxu0 %v3001_v0  ;;  %v2659_v1 = vld [vmem:[%s3402_s1 + $0x84] ss:$8 sps:$4 sm:$0xff]   ;;  %v2661_v2 = vld [vmem:[%s3402_s1 + $0x80] ss:$8 sps:$4 sm:$0xff]   ;;  %vm310_vm2 = vcmask 1048071  }
  0x48   : > { %s3425_s27 = smov (!%p299_p5, %s3048_s27), 1  ;;  %454 = vmatprep.subr.bf16.mxu0 %v2659_v1  ;;  %v2662_v3 = vld [vmem:[%s3402_s1 + $0x94] ss:$8 sps:$4 sm:$0xff]   ;;  %v2664_v4 = vld [vmem:[%s3402_s1 + $0x90] ss:$8 sps:$4 sm:$0xff]   ;;  %vm318_vm4 = vcmask 1040896  }
  0x49   : > { %455 = vmatpush1.bf16.msra.mxu0 %v2661_v2  ;;  %v2665_v5 = vld [vmem:[%s3402_s1 + $0xa4] ss:$8 sps:$4 sm:$0xff]   ;;  %s2541_s22 = sshll.u32 %s3425_s27, 4  ;;  %v2667_v6 = vld [vmem:[%s3402_s1 + $0xa0] ss:$8 sps:$4 sm:$0xff]   ;;  %vm821_vm5 = vcmask 1040384  }
  0x4a   : > { %456 = vmatprep.subr.bf16.mxu0 %v2662_v3  ;;  %s303_s10 = scalar_lea.vmem %s3401_s0, %s2541_s22  ;;  %v2668_v7 = vld [vmem:[%s3402_s1 + $0xb4] ss:$8 sps:$4 sm:$0xff]   ;;  %v2670_v8 = vld [vmem:[%s3402_s1 + $0xb0] ss:$8 sps:$4 sm:$0xff]   ;;  %v2671_v11 = vld [vmem:[%s3402_s1 + $0xc4] ss:$8 sps:$4 sm:$0xff]   ;;  %s308_s19 = scalar_lea.vmem %s3408_s7, %s2541_s22 }
  0x4b   : > { %v334_v9 = vld [vmem:[%s303_s10] sm:$0xff]  ;;  %v335_v10 = vld [vmem:[%s303_s10 + $0x8] sm:$0xff]  ;;  %v2674_v14 = vld [vmem:[%s3402_s1 + $0xd4] ss:$8 sps:$4 sm:$0xff]   ;;  %vm311_vm3 = vsmask.f32 7966 }
  0x4c   : > { %v336_v12 = vpack.c.bf16 %v335_v10, %v334_v9  ;;  %v2673_v13 = vld [vmem:[%s3402_s1 + $0xc0] ss:$8 sps:$4 sm:$0xff]   ;;  %v2676_v15 = vld [vmem:[%s3402_s1 + $0xd0] ss:$8 sps:$4 sm:$0xff]   ;;  %v2677_v16 = vld [vmem:[%s3402_s1 + $0xe4] ss:$8 sps:$4 sm:$0xff]  }
  0x4d   : > { %457 = vmatpush1.bf16.msra.mxu0 %v2664_v4  ;;  %vm312_vm6 = vmand %vm310_vm2, %vm311_vm3  ;;  %vm319_vm7 = vsmask.f32 256  ;;  %v2679_v19 = vld [vmem:[%s3402_s1 + $0xe0] ss:$8 sps:$4 sm:$0xff]   ;;  %v2680_v20 = vld [vmem:[%s3402_s1 + $0xf4] ss:$8 sps:$4 sm:$0xff]  }
  0x4e   : > { %458 = vmatprep.subr.bf16.mxu0 %v2665_v5  ;;  %338 = vst.msk [vmem:[#allocation2 + $0x8] sm:$0xff] %vm337_vm1, %v336_v12  ;;  %vm3177_vm8 = vmand %vm318_vm4, %vm319_vm7  ;;  %v313_v21 = vld [vmem:[#allocation2] sm:$0x80]  ;;  %v321_v23 = vld [vmem:[#allocation2 + $0x10] sm:$0x1]  ;;  %vm324_vm10 = vcmask 523271  }
  0x4f   : > { %vm3182_vm9 = vmand %vm821_vm5, %vm319_vm7  ;;  %v314_v22 = vsel %vm312_vm6, 0, %v313_v21  ;;  %v823_v24 = vld [vmem:[#allocation3 + $0x20] sm:$0x1]  ;;  %v322_v25 = vsel %vm3177_vm8, 0, %v321_v23  ;;  %v826_v27 = vld [vmem:[#allocation3 + $0x28] sm:$0x1] }
  0x50   : > { %315 = vst [vmem:[#allocation2] sm:$0x80] %v314_v22  ;;  %v824_v26 = vsel %vm3182_vm9, 0, %v823_v24  ;;  %v1630_v28 = vld [vmem:[#allocation4 + $0x20] sm:$0x1]  ;;  %v827_v29 = vsel %vm3182_vm9, 0, %v826_v27  ;;  %vm325_vm12 = vmand %vm324_vm10, %vm311_vm3 }
  0x51   : > { %459 = vmatpush1.bf16.msra.mxu0 %v2667_v6  ;;  %323 = vst [vmem:[#allocation2 + $0x10] sm:$0x1] %v322_v25  ;;  %v1631_v30 = vsel %vm3182_vm9, 0, %v1630_v28  ;;  %v1633_v31 = vld [vmem:[#allocation4 + $0x28] sm:$0x1]  ;;  %vm329_vm11 = vcmask 516096  }
  0x52   : > { %460 = vmatprep.subr.bf16.mxu0 %v2668_v7  ;;  %825 = vst [vmem:[#allocation3 + $0x20] sm:$0x1] %v824_v26  ;;  %v2682_v32 = vld [vmem:[%s3402_s1 + $0xf0] ss:$8 sps:$4 sm:$0xff]   ;;  %v1634_v33 = vsel %vm3182_vm9, 0, %v1633_v31  ;;  %vm330_vm13 = vmand %vm329_vm11, %vm319_vm7  ;;  %vm813_vm15 = vcmask 1047559  }
  0x53   : > { %828 = vst [vmem:[#allocation3 + $0x28] sm:$0x1] %v827_v29  ;;  %1632 = vst [vmem:[#allocation4 + $0x20] sm:$0x1] %v1631_v30  ;;  %v2685_v34 = vld [vmem:[%s3402_s1 + $0x4] ss:$8 sps:$4 sm:$0xff]  }
  0x54   : > { %1635 = vst [vmem:[#allocation4 + $0x28] sm:$0x1] %v1634_v33  ;;  %v2683_v35 = vld [vmem:[%s3402_s1] ss:$8 sps:$4 sm:$0xff]   ;;  %v2688_v37 = vld [vmem:[%s3402_s1 + $0x14] ss:$8 sps:$4 sm:$0xff]   ;;  %vm3318_vm0 = vmand %vm813_vm15, %vm311_vm3 }
  0x55   : > { %461 = vmatpush1.bf16.msra.mxu0 %v2670_v8  ;;  %v3214_v36 = vld [vmem:[#allocation2 + $0x8] sm:$0xff]  ;;  %v2686_v42 = vld [vmem:[%s3402_s1 + $0x10] ss:$8 sps:$4 sm:$0xff]   ;;  %v2731_v44 = vld [vmem:[#allocation5 + $0x104] ss:$8 sps:$4 sm:$0xff]  }
  0x56   : > { %462 = vmatprep.subr.bf16.mxu0 %v2671_v11  ;;  %v2691_v43 = vld [vmem:[%s3402_s1 + $0x24] ss:$8 sps:$4 sm:$0xff]   ;;  %v2733_v45 = vld [vmem:[#allocation5 + $0x100] ss:$8 sps:$4 sm:$0xff]   ;;  %v2694_v48 = vld [vmem:[%s3402_s1 + $0x34] ss:$8 sps:$4 sm:$0xff]   ;;  %1062 = vmatprep.subr.bf16.mxu1 %v2731_v44 }
  0x57   : > { %v326_v38 = vld [vmem:[#allocation2] sm:$0x80]  ;;  %v2689_v46 = vld [vmem:[%s3402_s1 + $0x20] ss:$8 sps:$4 sm:$0xff]   ;;  %v2734_v47 = vld [vmem:[#allocation5 + $0x114] ss:$8 sps:$4 sm:$0xff]   ;;  %1063 = vmatpush1.bf16.msra.mxu1 %v2733_v45 }
  0x58   : > { %v327_v39 = vsel %vm325_vm12, 0, %v326_v38  ;;  %v331_v40 = vld [vmem:[#allocation2 + $0x10] sm:$0x1]  ;;  %1064 = vmatprep.subr.bf16.mxu1 %v2734_v47  ;;  %v2737_v50 = vld [vmem:[#allocation5 + $0x124] ss:$8 sps:$4 sm:$0xff]   ;;  %v502_v60 = vshrl.u32 %v3214_v36, 16 }
  0x59   : > { %463 = vmatpush1.bf16.msra.mxu0 %v2673_v13  ;;  %328 = vst [vmem:[#allocation2] sm:$0x80] %v327_v39  ;;  %v332_v41 = vsel %vm330_vm13, 0, %v331_v40  ;;  %v2736_v49 = vld [vmem:[#allocation5 + $0x110] ss:$8 sps:$4 sm:$0xff]   ;;  %v505_v6 = vshll.u32 %v3214_v36, 16 }
  0x5a   : > { %464 = vmatprep.subr.bf16.mxu0 %v2674_v14  ;;  %333 = vst [vmem:[#allocation2 + $0x10] sm:$0x1] %v332_v41  ;;  %v2692_v51 = vld [vmem:[%s3402_s1 + $0x30] ss:$8 sps:$4 sm:$0xff]   ;;  %v2697_v52 = vld [vmem:[%s3402_s1 + $0x44] ss:$8 sps:$4 sm:$0xff]  }
  0x5b   : > { %1065 = vmatpush1.bf16.msra.mxu1 %v2736_v49  ;;  %v2739_v53 = vld [vmem:[#allocation5 + $0x120] ss:$8 sps:$4 sm:$0xff]   ;;  %v2740_v54 = vld [vmem:[#allocation5 + $0x134] ss:$8 sps:$4 sm:$0xff]   ;;  %v2742_v57 = vld [vmem:[#allocation5 + $0x130] ss:$8 sps:$4 sm:$0xff]  }
  0x5c   : > { %1066 = vmatprep.subr.bf16.mxu1 %v2737_v50  ;;  %v2695_v55 = vld [vmem:[%s3402_s1 + $0x40] ss:$8 sps:$4 sm:$0xff]   ;;  %v2700_v56 = vld [vmem:[%s3402_s1 + $0x54] ss:$8 sps:$4 sm:$0xff]   ;;  %v2698_v59 = vld [vmem:[%s3402_s1 + $0x50] ss:$8 sps:$4 sm:$0xff]  }
  0x5d   : > { %465 = vmatpush1.bf16.msra.mxu0 %v2676_v15  ;;  %v2743_v58 = vld [vmem:[#allocation5 + $0x144] ss:$8 sps:$4 sm:$0xff]   ;;  %v2745_v63 = vld [vmem:[#allocation5 + $0x140] ss:$8 sps:$4 sm:$0xff]   ;;  %v2746_v1 = vld [vmem:[#allocation5 + $0x154] ss:$8 sps:$4 sm:$0xff]  }
  0x5e   : > { %466 = vmatprep.subr.bf16.mxu0 %v2677_v16  ;;  %v2703_v61 = vld [vmem:[%s3402_s1 + $0x64] ss:$8 sps:$4 sm:$0xff]   ;;  %v2701_v2 = vld [vmem:[%s3402_s1 + $0x60] ss:$8 sps:$4 sm:$0xff]   ;;  %v2706_v3 = vld [vmem:[%s3402_s1 + $0x74] ss:$8 sps:$4 sm:$0xff]  }
  0x5f   : > { %1067 = vmatpush1.bf16.msra.mxu1 %v2739_v53  ;;  %v2748_v4 = vld [vmem:[#allocation5 + $0x150] ss:$8 sps:$4 sm:$0xff]   ;;  %v504_v5 = vrot.slane %v502_v60, 7  ;;  %v2749_v8 = vld [vmem:[#allocation5 + $0x164] ss:$8 sps:$4 sm:$0xff]   ;;  %v658_v33 = vrot.slane %v505_v6, 1 }
  0x60   : > { %1068 = vmatprep.subr.bf16.mxu1 %v2740_v54  ;;  %v339_v62 = vld [vmem:[#allocation2] sm:$0x80]  ;;  %v2704_v9 = vld [vmem:[%s3402_s1 + $0x70] ss:$8 sps:$4 sm:$0xff]   ;;  %v2752_v14 = vld [vmem:[#allocation5 + $0x174] ss:$8 sps:$4 sm:$0xff]  }
  0x61   : > { %467 = vmatpush1.bf16.msra.mxu0 %v2679_v19  ;;  %v498_v7 = vshrl.u32 %v339_v62, 16  ;;  %v2709_v10 = vld [vmem:[%s3402_s1 + $0x104] ss:$8 sps:$4 sm:$0xff]   ;;  %v2751_v11 = vld [vmem:[#allocation5 + $0x160] ss:$8 sps:$4 sm:$0xff]   ;;  %v507_v12 = vor.u32 %v505_v6, %v504_v5  ;;  %v659_v44 = vor.u32 %v658_v33, %v502_v60 }
  0x62   : > { %468 = vmatprep.subr.bf16.mxu0 %v2680_v20  ;;  %v2707_v15 = vld [vmem:[%s3402_s1 + $0x100] ss:$8 sps:$4 sm:$0xff]   ;;  %v2712_v16 = vld [vmem:[%s3402_s1 + $0x114] ss:$8 sps:$4 sm:$0xff]   ;;  %v2710_v20 = vld [vmem:[%s3402_s1 + $0x110] ss:$8 sps:$4 sm:$0xff]  }
  0x63   : > { %1069 = vmatpush1.bf16.msra.mxu1 %v2742_v57  ;;  %v500_v13 = vrot.slane %v498_v7, 7  ;;  %v2754_v17 = vld [vmem:[#allocation5 + $0x170] ss:$8 sps:$4 sm:$0xff]   ;;  %v2755_v19 = vld [vmem:[#allocation5 + $0x184] ss:$8 sps:$4 sm:$0xff]  }
  0x64   : > { %1070 = vmatprep.subr.bf16.mxu1 %v2743_v58  ;;  %v2715_v21 = vld [vmem:[%s3402_s1 + $0x124] ss:$8 sps:$4 sm:$0xff]   ;;  %v2757_v22 = vld [vmem:[#allocation5 + $0x180] ss:$8 sps:$4 sm:$0xff]   ;;  %v634_v23 = vld [vmem:[#allocation2 + $0x10] sm:$0x1] }
  0x65   : > { %469 = vmatpush1.bf16.msra.mxu0 %v2682_v32  ;;  %v508_v18 = vsel %vm319_vm7, %v500_v13, %v507_v12  ;;  %v2758_v24 = vld [vmem:[#allocation5 + $0x194] ss:$8 sps:$4 sm:$0xff]   ;;  %v2713_v25 = vld [vmem:[%s3402_s1 + $0x120] ss:$8 sps:$4 sm:$0xff]   ;;  %v2761_v28 = vld [vmem:[#allocation5 + $0x1a4] ss:$8 sps:$4 sm:$0xff]  }
  0x66   : > { %590 = vmatprep.subr.bf16.mxu0 %v2685_v34  ;;  %v2718_v26 = vld [vmem:[%s3402_s1 + $0x134] ss:$8 sps:$4 sm:$0xff]   ;;  %v2760_v27 = vld [vmem:[#allocation5 + $0x190] ss:$8 sps:$4 sm:$0xff]   ;;  %v661_v29 = vshll.u32 %v634_v23, 16 }
  0x67   : > { %1071 = vmatpush1.bf16.msra.mxu1 %v2745_v63  ;;  %v2721_v30 = vld [vmem:[%s3402_s1 + $0x144] ss:$8 sps:$4 sm:$0xff]   ;;  %v2763_v31 = vld [vmem:[#allocation5 + $0x1a0] ss:$8 sps:$4 sm:$0xff]   ;;  %v2766_v38 = vld [vmem:[#allocation5 + $0x1b0] ss:$8 sps:$4 sm:$0xff]  }
  0x68   : > { %487 = vmatmul.mubr.bf16.vlgmr.msra.gmra.mrb[0].mxu0 %v3214_v36  ;;  %1072 = vmatprep.subr.bf16.mxu1 %v2746_v1  ;;  %v2764_v32 = vld [vmem:[#allocation5 + $0x1b4] ss:$8 sps:$4 sm:$0xff]   ;;  %v663_v34 = vrot.slane %v661_v29, 1  ;;  %v2722_v39 = vld [vmem:[%s3402_s1 + $0x150] ss:$8 sps:$4 sm:$0xff]  }
  0x69   : > { %591 = vmatpush1.bf16.msra.mxu0 %v2683_v35  ;;  %622 = vmatprep.mubr.bf16.mxu0 %v3001_v0  ;;  %v2719_v35 = vld [vmem:[%s3402_s1 + $0x140] ss:$8 sps:$4 sm:$0xff]   ;;  %v2727_v40 = vld [vmem:[%s3402_s1 + $0x164] ss:$8 sps:$4 sm:$0xff]   ;;  %vm652_vm14 = vsmask.f32 7424 }
  0x6a   : > { %592 = vmatprep.subr.bf16.mxu0 %v2688_v37  ;;  %v2724_v37 = vld [vmem:[%s3402_s1 + $0x154] ss:$8 sps:$4 sm:$0xff]   ;;  %v2725_v41 = vld [vmem:[%s3402_s1 + $0x160] ss:$8 sps:$4 sm:$0xff]   ;;  %v664_v45 = vsel %vm652_vm14, %v659_v44, %v663_v34  ;;  %v818_v53 = vld [vmem:[#allocation3 + $0x8] sm:$0x80] }
  0x6b   : > { %1073 = vmatpush1.bf16.msra.mxu1 %v2748_v4  ;;  %v2769_v47 = vld [vmem:[#allocation5 + $0x1c0] ss:$8 sps:$4 sm:$0xff]   ;;  %v2772_v49 = vld [vmem:[#allocation5 + $0x1d0] ss:$8 sps:$4 sm:$0xff]   ;;  %v2773_v50 = vld [vmem:[#allocation5 + $0x1e4] ss:$8 sps:$4 sm:$0xff]  }
  0x6c   : > { %1074 = vmatprep.subr.bf16.mxu1 %v2749_v8  ;;  %v2778_v57 = vld [vmem:[#allocation5 + $0x1f0] ss:$8 sps:$4 sm:$0xff]   ;;  %v2781_v58 = vld [vmem:[#allocation5 + $0x4] ss:$8 sps:$4 sm:$0xff]   ;;  %v793_v62 = vld [vmem:[%s3403_s2] sm:$0x3] }
  0x6d   : > { %593 = vmatpush1.bf16.msra.mxu0 %v2686_v42  ;;  %v2730_v42 = vld [vmem:[%s3402_s1 + $0x174] ss:$8 sps:$4 sm:$0xff]   ;;  %v2878_v34 = vld [vmem:[#allocation7 + $0x88] sm:$0xff]  }
  0x6e   : > { %594 = vmatprep.subr.bf16.mxu0 %v2691_v43  ;;  %v2728_v43 = vld [vmem:[%s3402_s1 + $0x170] ss:$8 sps:$4 sm:$0xff]  }
  0x6f   : > { %1075 = vmatpush1.bf16.msra.mxu1 %v2751_v11  ;;  %v2882_v44 = vld [vmem:[#allocation7 + $0x98] sm:$0xff]  }
  0x70   : > { %1076 = vmatprep.subr.bf16.mxu1 %v2752_v14 }
  0x71   : > { %595 = vmatpush1.bf16.msra.mxu0 %v2689_v46  ;;  %v2767_v46 = vld [vmem:[#allocation5 + $0x1c4] ss:$8 sps:$4 sm:$0xff]  }
  0x72   : > { %596 = vmatprep.subr.bf16.mxu0 %v2694_v48  ;;  %v2770_v48 = vld [vmem:[#allocation5 + $0x1d4] ss:$8 sps:$4 sm:$0xff]  }
  0x73   : > { %1077 = vmatpush1.bf16.msra.mxu1 %v2754_v17 }
  0x74   : > { %1078 = vmatprep.subr.bf16.mxu1 %v2755_v19 }
  0x75   : > { %597 = vmatpush1.bf16.msra.mxu0 %v2692_v51  ;;  %v2775_v51 = vld [vmem:[#allocation5 + $0x1e0] ss:$8 sps:$4 sm:$0xff]  }
  0x76   : > { %598 = vmatprep.subr.bf16.mxu0 %v2697_v52  ;;  %v815_v52 = vld [vmem:[#allocation3] sm:$0x80] }
  0x77   : > { %1079 = vmatpush1.bf16.msra.mxu1 %v2757_v22  ;;  %v816_v54 = vsel %vm3318_vm0, 0, %v815_v52  ;;  %v2805_v52 = vld [vmem:[#allocation5 + $0x84] ss:$8 sps:$4 sm:$0xff]  }
  0x78   : > { %1080 = vmatprep.subr.bf16.mxu1 %v2758_v24  ;;  %817 = vst [vmem:[#allocation3] sm:$0x80] %v816_v54  ;;  %v2808_v54 = vld [vmem:[#allocation5 + $0x94] ss:$8 sps:$4 sm:$0xff]  }
  0x79   : > { %599 = vmatpush1.bf16.msra.mxu0 %v2695_v55  ;;  %v2776_v55 = vld [vmem:[#allocation5 + $0x1f4] ss:$8 sps:$4 sm:$0xff]  }
  0x7a   : > { %600 = vmatprep.subr.bf16.mxu0 %v2700_v56  ;;  %v819_v56 = vsel %vm3318_vm0, 0, %v818_v53  ;;  %v2803_v53 = vld [vmem:[#allocation5 + $0x80] ss:$8 sps:$4 sm:$0xff]  }
  0x7b   : > { %1081 = vmatpush1.bf16.msra.mxu1 %v2760_v27  ;;  %820 = vst [vmem:[#allocation3 + $0x8] sm:$0x80] %v819_v56  ;;  %v2877_v27 = vld [vmem:[#allocation7 + $0xc8] sm:$0xff]  }
  0x7c   : > { %1082 = vmatprep.subr.bf16.mxu1 %v2761_v28  ;;  %v2811_v56 = vld [vmem:[#allocation5 + $0xa4] ss:$8 sps:$4 sm:$0xff]  }
  0x7d   : > { %601 = vmatpush1.bf16.msra.mxu0 %v2698_v59  ;;  %v795_v59 = vlaneseq }
  0x7e   : > { %602 = vmatprep.subr.bf16.mxu0 %v2703_v61 }
  0x7f   : > { %1083 = vmatpush1.bf16.msra.mxu1 %v2763_v31  ;;  %v3326_v60 = vshrl.u32 %v795_v59, 7  ;;  %v2787_v31 = vld [vmem:[#allocation5 + $0x24] ss:$8 sps:$4 sm:$0xff]   ;;  %v2812_v59 = vld [vmem:[#allocation5 + $0xb0] ss:$8 sps:$4 sm:$0xff]  }
  0x80   : > { %1084 = vmatprep.subr.bf16.mxu1 %v2764_v32 }
  0x81   : > { %603 = vmatpush1.bf16.msra.mxu0 %v2701_v2  ;;  %v797_v61 = vsub.s32 0, %v3326_v60  ;;  %v801_v63 = vsub.s32 1, %v3326_v60  ;;  %v2893_v60 = vld [vmem:[#allocation7 + $0x48] sm:$0xff]  }
  0x82   : > { %604 = vmatprep.subr.bf16.mxu0 %v2706_v3  ;;  %v834_v13 = vld [vmem:[#allocation3 + $0x8] sm:$0x80] }
  0x83   : > { %1085 = vmatpush1.bf16.msra.mxu1 %v2766_v38  ;;  %v798_v1 = vrot.slane %v793_v62, %v797_v61  ;;  %v802_v2 = vrot.slane %v793_v62, %v801_v63  ;;  %v1118_v19 = vshrl.u32 %v834_v13, 16  ;;  %v2785_v38 = vld [vmem:[#allocation5 + $0x20] ss:$8 sps:$4 sm:$0xff]   ;;  %v2817_v62 = vld [vmem:[#allocation5 + $0xc4] ss:$8 sps:$4 sm:$0xff]  }
  0x84   : > { %1086 = vmatprep.subr.bf16.mxu1 %v2767_v46  ;;  %v2796_v46 = vld [vmem:[#allocation5 + $0x54] ss:$8 sps:$4 sm:$0xff]   ;;  %v2824_v13 = vld [vmem:[#allocation5 + $0xf0] ss:$8 sps:$4 sm:$0xff]  }
  0x85   : > { %605 = vmatpush1.bf16.msra.mxu0 %v2704_v9 }
  0x86   : > { %746 = vmatprep.subr.bf16.mxu0 %v2709_v10 }
  0x87   : > { %1087 = vmatpush1.bf16.msra.mxu1 %v2769_v47  ;;  %v2794_v47 = vld [vmem:[#allocation5 + $0x50] ss:$8 sps:$4 sm:$0xff]  }
  0x88   : > { %623 = vmatmul.mubr.bf16.vlgmr.msra.gmra.mrb[0].mxu0 %v508_v18  ;;  %1088 = vmatprep.subr.bf16.mxu1 %v2770_v48  ;;  %v2779_v18 = vld [vmem:[#allocation5] ss:$8 sps:$4 sm:$0xff]   ;;  %v2799_v48 = vld [vmem:[#allocation5 + $0x64] ss:$8 sps:$4 sm:$0xff]  }
  0x89   : > { %747 = vmatpush1.bf16.msra.mxu0 %v2707_v15  ;;  %778 = vmatprep.mubr.bf16.mxu0 %v3001_v0  ;;  %v2716_v0 = vld [vmem:[%s3402_s1 + $0x130] ss:$8 sps:$4 sm:$0xff]  }
  0x8a   : > { %748 = vmatprep.subr.bf16.mxu0 %v2712_v16 }
  0x8b   : > { %1089 = vmatpush1.bf16.msra.mxu1 %v2772_v49  ;;  %v2797_v49 = vld [vmem:[#allocation5 + $0x60] ss:$8 sps:$4 sm:$0xff]  }
  0x8c   : > { %1090 = vmatprep.subr.bf16.mxu1 %v2773_v50  ;;  %v2802_v50 = vld [vmem:[#allocation5 + $0x74] ss:$8 sps:$4 sm:$0xff]  }
  0x8d   : > { %749 = vmatpush1.bf16.msra.mxu0 %v2710_v20 }
  0x8e   : > { %750 = vmatprep.subr.bf16.mxu0 %v2715_v21  ;;  %v2784_v21 = vld [vmem:[#allocation5 + $0x14] ss:$8 sps:$4 sm:$0xff]  }
  0x8f   : > { %1091 = vmatpush1.bf16.msra.mxu1 %v2775_v51  ;;  %v2800_v51 = vld [vmem:[#allocation5 + $0x70] ss:$8 sps:$4 sm:$0xff]  }
  0x90   : > { %1092 = vmatprep.subr.bf16.mxu1 %v2776_v55  ;;  %v2806_v55 = vld [vmem:[#allocation5 + $0x90] ss:$8 sps:$4 sm:$0xff]  }
  0x91   : > { %751 = vmatpush1.bf16.msra.mxu0 %v2713_v25  ;;  %v2875_v25 = vld [vmem:[#allocation7 + $0xc0] sm:$0xff]  }
  0x92   : > { %752 = vmatprep.subr.bf16.mxu0 %v2718_v26  ;;  %v2876_v26 = vld [vmem:[#allocation7 + $0x80] sm:$0xff]  }
  0x93   : > { %1093 = vmatpush1.bf16.msra.mxu1 %v2778_v57  ;;  %v2809_v57 = vld [vmem:[#allocation5 + $0xa0] ss:$8 sps:$4 sm:$0xff]  }
  0x94   : > { %1291 = vmatprep.subr.bf16.mxu1 %v2781_v58  ;;  %v2814_v58 = vld [vmem:[#allocation5 + $0xb4] ss:$8 sps:$4 sm:$0xff]  }
  0x95   : > { %753 = vmatpush1.bf16.msra.mxu0 %v2716_v0  ;;  %v2782_v0 = vld [vmem:[#allocation5 + $0x10] ss:$8 sps:$4 sm:$0xff]  }
  0x96   : > { %754 = vmatprep.subr.bf16.mxu0 %v2721_v30  ;;  %v1120_v30 = vrot.slane %v1118_v19, 7 }
  0x99   : > { %755 = vmatpush1.bf16.msra.mxu0 %v2719_v35  ;;  %v2879_v35 = vld [vmem:[#allocation7 + $0xd0] sm:$0xff]  }
  0x9a   : > { %756 = vmatprep.subr.bf16.mxu0 %v2724_v37 }
  0x9d   : > { %757 = vmatpush1.bf16.msra.mxu0 %v2722_v39  ;;  %v2790_v39 = vld [vmem:[#allocation5 + $0x34] ss:$8 sps:$4 sm:$0xff]  }
  0x9e   : > { %758 = vmatprep.subr.bf16.mxu0 %v2727_v40  ;;  %v2880_v40 = vld [vmem:[#allocation7 + $0x90] sm:$0xff]  }
  0xa1   : > { %759 = vmatpush1.bf16.msra.mxu0 %v2725_v41  ;;  %v2881_v41 = vld [vmem:[#allocation7 + $0xd8] sm:$0xff]  }
  0xa2   : > { %760 = vmatprep.subr.bf16.mxu0 %v2730_v42  ;;  %v2788_v42 = vld [vmem:[#allocation5 + $0x30] ss:$8 sps:$4 sm:$0xff]  }
  0xa5   : > { %761 = vmatpush1.bf16.msra.mxu0 %v2728_v43  ;;  %v2793_v43 = vld [vmem:[#allocation5 + $0x44] ss:$8 sps:$4 sm:$0xff]  }
  0xa6   : > { %2543 = vmatprep.subr.bf16.mxu0 %v2875_v25 }
  0xa8   : > { %779 = vmatmul.mubr.bf16.vlgmr.msra.gmra.mrb[0].mxu0 %v664_v45  ;;  %v2791_v45 = vld [vmem:[#allocation5 + $0x40] ss:$8 sps:$4 sm:$0xff]  }
  0xa9   : > { %2544 = vmatpush3.bf16.msra.mxu0 %v2876_v26 }
  0xaa   : > { %2545 = vmatprep.subr.bf16.mxu0 %v2877_v27  ;;  %v2830_v27 = vld [vmem:[#allocation5 + $0x210] ss:$8 sps:$4 sm:$0xff]  }
  0xad   : > { %2546 = vmatpush3.bf16.msra.mxu0 %v2878_v34  ;;  %v2850_v34 = vld [vmem:[#allocation5 + $0x274] ss:$8 sps:$4 sm:$0xff]  }
  0xae   : > { %2547 = vmatprep.subr.bf16.mxu0 %v2879_v35  ;;  %v2848_v35 = vld [vmem:[#allocation5 + $0x270] ss:$8 sps:$4 sm:$0xff]  }
  0xb1   : > { %2548 = vmatpush3.bf16.msra.mxu0 %v2880_v40  ;;  %v2854_v40 = vld [vmem:[#allocation5 + $0x290] ss:$8 sps:$4 sm:$0xff]  }
  0xb2   : > { %2549 = vmatprep.subr.bf16.mxu0 %v2881_v41  ;;  %v2859_v41 = vld [vmem:[#allocation5 + $0x2a4] ss:$8 sps:$4 sm:$0xff]  }
  0xb5   : > { %2550 = vmatpush3.bf16.msra.mxu0 %v2882_v44  ;;  %v2860_v44 = vld [vmem:[#allocation5 + $0x2b0] ss:$8 sps:$4 sm:$0xff]  }
 0x17b   : > { %v780_v3 = vpop.f32.mrb[0].mxu0 }
 0x17c   : > { %v805_v4 = vadd.f32 %v798_v1, %v780_v3  ;;  %v782_v5 = vpop.f32.mrb[1].mxu0  ;;  %v2818_v3 = vld [vmem:[#allocation5 + $0xd0] ss:$8 sps:$4 sm:$0xff]  }
 0x17d   : > { %v806_v6 = vadd.f32 %v802_v2, %v782_v5  ;;  %v784_v7 = vpop.f32.mrb[2].mxu0  ;;  %v833_v5 = vld [vmem:[#allocation3] sm:$0x80] }
 0x17e   : > { %v807_v8 = vadd.f32 %v798_v1, %v784_v7  ;;  %v786_v9 = vpop.f32.mrb[3].mxu0  ;;  %v809_v11 = vmax.f32 %v805_v4, 0.0  ;;  %v2815_v1 = vld [vmem:[#allocation5 + $0xc0] ss:$8 sps:$4 sm:$0xff]   ;;  %v2823_v4 = vld [vmem:[#allocation5 + $0xe4] ss:$8 sps:$4 sm:$0xff]  }
 0x17f   : > { %v808_v10 = vadd.f32 %v802_v2, %v786_v9  ;;  %v810_v14 = vmax.f32 %v806_v6, 0.0  ;;  %v2820_v2 = vld [vmem:[#allocation5 + $0xd4] ss:$8 sps:$4 sm:$0xff]   ;;  %v2821_v6 = vld [vmem:[#allocation5 + $0xe0] ss:$8 sps:$4 sm:$0xff]  }
 0x180   : > { %v811_v12 = vmax.f32 %v807_v8, 0.0  ;;  %v1337_v7 = vld [vmem:[#allocation3 + $0x28] sm:$0x1]  ;;  %v2826_v8 = vld [vmem:[#allocation5 + $0xf4] ss:$8 sps:$4 sm:$0xff]  }
 0x181   : > { %v812_v15 = vmax.f32 %v808_v10, 0.0  ;;  %v1106_v10 = vshrl.u32 %v833_v5, 16 }
 0x182   : > { %v3337_v16 = vpack.c.bf16 %v811_v12, %v809_v11  ;;  %v1391_v12 = vshll.u32 %v1337_v7, 16  ;;  %v2890_v7 = vld [vmem:[#allocation7 + $0xb8] sm:$0xff]  }
 0x183   : > { %v3339_v17 = vpack.c.bf16 %v812_v15, %v810_v14  ;;  %v2829_v14 = vld [vmem:[#allocation5 + $0x204] ss:$8 sps:$4 sm:$0xff]  }
 0x184   : > { %v1113_v20 = vshll.u32 %v3337_v16, 16  ;;  %v1110_v23 = vshrl.u32 %v3337_v16, 16 }
 0x185   : > { %1094 = vmatprep.mubr.bf16.mxu1 %v3339_v17  ;;  %v1122_v22 = vshrl.u32 %v3339_v17, 16  ;;  %v1125_v29 = vshll.u32 %v3339_v17, 16  ;;  %v2838_v17 = vld [vmem:[#allocation5 + $0x234] ss:$8 sps:$4 sm:$0xff]  }
 0x186   : > { %1095 = vmatmul.mubr.bf16.vlgmr.msra.gmra.mrb[0].mxu1 %v3337_v16  ;;  %v1376_v24 = vrot.slane %v1113_v20, 1  ;;  %v1112_v9 = vrot.slane %v1110_v23, 7  ;;  %v2835_v16 = vld [vmem:[#allocation5 + $0x224] ss:$8 sps:$4 sm:$0xff]  }
 0x187   : > { %v1124_v28 = vrot.slane %v1122_v22, 7  ;;  %1292 = vmatpush1.bf16.msra.mxu1 %v2779_v18  ;;  %v1388_v11 = vrot.slane %v1125_v29, 1  ;;  %v1108_v18 = vrot.slane %v1106_v10, 7 }
 0x188   : > { %1293 = vmatprep.subr.bf16.mxu1 %v2784_v21  ;;  %v3353_v32 = vor.u32 %v1376_v24, %v1110_v23  ;;  %v1115_v15 = vor.u32 %v1113_v20, %v1112_v9  ;;  %v1393_v21 = vrot.slane %v1391_v12, 1  ;;  %v2827_v24 = vld [vmem:[#allocation5 + $0x200] ss:$8 sps:$4 sm:$0xff]   ;;  %v2832_v23 = vld [vmem:[#allocation5 + $0x214] ss:$8 sps:$4 sm:$0xff]  }
 0x189   : > { %v1127_v33 = vor.u32 %v1125_v29, %v1124_v28  ;;  %v1389_v19 = vor.u32 %v1388_v11, %v1122_v22  ;;  %v2833_v20 = vld [vmem:[#allocation5 + $0x220] ss:$8 sps:$4 sm:$0xff]   ;;  %v2836_v22 = vld [vmem:[#allocation5 + $0x230] ss:$8 sps:$4 sm:$0xff]   ;;  %v2841_v28 = vld [vmem:[#allocation5 + $0x244] ss:$8 sps:$4 sm:$0xff]  }
 0x18a   : > { %v1116_v25 = vsel %vm319_vm7, %v1108_v18, %v1115_v15  ;;  %v2839_v29 = vld [vmem:[#allocation5 + $0x240] ss:$8 sps:$4 sm:$0xff]  }
 0x18b   : > { %1294 = vmatpush1.bf16.msra.mxu1 %v2782_v0  ;;  %v1128_v37 = vsel %vm319_vm7, %v1120_v30, %v1127_v33  ;;  %v1394_v26 = vsel %vm652_vm14, %v1389_v19, %v1393_v21  ;;  %v2844_v0 = vld [vmem:[#allocation5 + $0x254] ss:$8 sps:$4 sm:$0xff]   ;;  %v2842_v30 = vld [vmem:[#allocation5 + $0x250] ss:$8 sps:$4 sm:$0xff]   ;;  %v2845_v33 = vld [vmem:[#allocation5 + $0x260] ss:$8 sps:$4 sm:$0xff]  }
 0x18c   : > { %1323 = vmatprep.mubr.bf16.mxu1 %v1128_v37  ;;  %1295 = vmatprep.subr.bf16.mxu1 %v2787_v31  ;;  %v2847_v31 = vld [vmem:[#allocation5 + $0x264] ss:$8 sps:$4 sm:$0xff]   ;;  %v1604_v9 = vld [vmem:[%s3405_s4] sm:$0x3] }
 0x18d   : > { %v2853_v37 = vld [vmem:[#allocation5 + $0x284] ss:$8 sps:$4 sm:$0xff]   ;;  %v1609_v10 = vrot.slane %v1604_v9, %v797_v61  ;;  %v1613_v11 = vrot.slane %v1604_v9, %v801_v63 }
 0x18e   : > { %v2892_v61 = vld [vmem:[#allocation7] sm:$0xff]   ;;  %v2917_v9 = vld [vmem:[#allocation7 + $0x168] sm:$0xff]  }
 0x18f   : > { %1296 = vmatpush1.bf16.msra.mxu1 %v2785_v38  ;;  %v2851_v38 = vld [vmem:[#allocation5 + $0x280] ss:$8 sps:$4 sm:$0xff]  }
 0x190   : > { %1297 = vmatprep.subr.bf16.mxu1 %v2790_v39  ;;  %v2856_v39 = vld [vmem:[#allocation5 + $0x294] ss:$8 sps:$4 sm:$0xff]  }
 0x193   : > { %1298 = vmatpush1.bf16.msra.mxu1 %v2788_v42  ;;  %v2857_v42 = vld [vmem:[#allocation5 + $0x2a0] ss:$8 sps:$4 sm:$0xff]  }
 0x194   : > { %1299 = vmatprep.subr.bf16.mxu1 %v2793_v43  ;;  %v2862_v43 = vld [vmem:[#allocation5 + $0x2b4] ss:$8 sps:$4 sm:$0xff]  }
 0x197   : > { %1300 = vmatpush1.bf16.msra.mxu1 %v2791_v45  ;;  %v2865_v45 = vld [vmem:[#allocation5 + $0x2c4] ss:$8 sps:$4 sm:$0xff]  }
 0x198   : > { %1301 = vmatprep.subr.bf16.mxu1 %v2796_v46  ;;  %v2863_v46 = vld [vmem:[#allocation5 + $0x2c0] ss:$8 sps:$4 sm:$0xff]  }
 0x19b   : > { %1302 = vmatpush1.bf16.msra.mxu1 %v2794_v47  ;;  %v2868_v47 = vld [vmem:[#allocation5 + $0x2d4] ss:$8 sps:$4 sm:$0xff]  }
 0x19c   : > { %1303 = vmatprep.subr.bf16.mxu1 %v2799_v48  ;;  %v2866_v48 = vld [vmem:[#allocation5 + $0x2d0] ss:$8 sps:$4 sm:$0xff]  }
 0x19f   : > { %1304 = vmatpush1.bf16.msra.mxu1 %v2797_v49  ;;  %v2871_v49 = vld [vmem:[#allocation5 + $0x2e4] ss:$8 sps:$4 sm:$0xff]  }
 0x1a0   : > { %1305 = vmatprep.subr.bf16.mxu1 %v2802_v50  ;;  %v1336_v50 = vld [vmem:[#allocation3 + $0x20] sm:$0x1] }
 0x1a3   : > { %1306 = vmatpush1.bf16.msra.mxu1 %v2800_v51  ;;  %v2869_v51 = vld [vmem:[#allocation5 + $0x2e0] ss:$8 sps:$4 sm:$0xff]  }
 0x1a4   : > { %1307 = vmatprep.subr.bf16.mxu1 %v2805_v52  ;;  %v2874_v52 = vld [vmem:[#allocation5 + $0x2f4] ss:$8 sps:$4 sm:$0xff]  }
 0x1a7   : > { %1308 = vmatpush1.bf16.msra.mxu1 %v2803_v53  ;;  %v1379_v53 = vshll.u32 %v1336_v50, 16 }
 0x1a8   : > { %1309 = vmatprep.subr.bf16.mxu1 %v2808_v54  ;;  %v2872_v54 = vld [vmem:[#allocation5 + $0x2f0] ss:$8 sps:$4 sm:$0xff]  }
 0x1ab   : > { %1310 = vmatpush1.bf16.msra.mxu1 %v2806_v55  ;;  %v1381_v55 = vrot.slane %v1379_v53, 1  ;;  %v2906_v53 = vld [vmem:[#allocation7 + $0x38] sm:$0xff]  }
 0x1ac   : > { %1311 = vmatprep.subr.bf16.mxu1 %v2811_v56 }
 0x1ad   : > { %v1382_v56 = vsel %vm652_vm14, %v3353_v32, %v1381_v55 }
 0x1af   : > { %1312 = vmatpush1.bf16.msra.mxu1 %v2809_v57  ;;  %v2883_v57 = vld [vmem:[#allocation7 + $0xe0] sm:$0xff]  }
 0x1b0   : > { %1313 = vmatprep.subr.bf16.mxu1 %v2814_v58  ;;  %v2884_v58 = vld [vmem:[#allocation7 + $0xa0] sm:$0xff]   ;;  %2551 = vmatprep.subr.bf16.mxu0 %v2883_v57 }
 0x1b1   : > { %2552 = vmatpush3.bf16.msra.mxu0 %v2884_v58 }
 0x1b3   : > { %1314 = vmatpush1.bf16.msra.mxu1 %v2812_v59  ;;  %v2885_v59 = vld [vmem:[#allocation7 + $0xe8] sm:$0xff]  }
 0x1b4   : > { %1315 = vmatprep.subr.bf16.mxu1 %v2817_v62  ;;  %v2886_v62 = vld [vmem:[#allocation7 + $0xa8] sm:$0xff]   ;;  %2553 = vmatprep.subr.bf16.mxu0 %v2885_v59  ;;  %v2908_v59 = vld [vmem:[#allocation7 + $0x100] sm:$0xff]  }
 0x1b5   : > { %2554 = vmatpush3.bf16.msra.mxu0 %v2886_v62  ;;  %v2909_v62 = vld [vmem:[#allocation7 + $0x148] sm:$0xff]  }
 0x1b7   : > { %1316 = vmatpush1.bf16.msra.mxu1 %v2815_v1  ;;  %v2887_v1 = vld [vmem:[#allocation7 + $0xf0] sm:$0xff]  }
 0x1b8   : > { %1317 = vmatprep.subr.bf16.mxu1 %v2820_v2  ;;  %v2888_v2 = vld [vmem:[#allocation7 + $0xb0] sm:$0xff]   ;;  %2555 = vmatprep.subr.bf16.mxu0 %v2887_v1 }
 0x1b9   : > { %2556 = vmatpush3.bf16.msra.mxu0 %v2888_v2 }
 0x1bb   : > { %1318 = vmatpush1.bf16.msra.mxu1 %v2818_v3  ;;  %v1624_v3 = vld [vmem:[#allocation4] sm:$0x80] }
 0x1bc   : > { %1319 = vmatprep.subr.bf16.mxu1 %v2823_v4  ;;  %v1627_v4 = vld [vmem:[#allocation4 + $0x8] sm:$0x80]  ;;  %v1625_v5 = vsel %vm3318_vm0, 0, %v1624_v3  ;;  %v2910_v3 = vld [vmem:[#allocation7 + $0x108] sm:$0xff]  }
 0x1bd   : > { %v1628_v32 = vsel %vm3318_vm0, 0, %v1627_v4  ;;  %1626 = vst [vmem:[#allocation4] sm:$0x80] %v1625_v5  ;;  %v2911_v4 = vld [vmem:[#allocation7 + $0x150] sm:$0xff]  }
 0x1be   : > { %1629 = vst [vmem:[#allocation4 + $0x8] sm:$0x80] %v1628_v32  ;;  %v2912_v5 = vld [vmem:[#allocation7 + $0x110] sm:$0xff]   ;;  %v2914_v32 = vld [vmem:[#allocation7 + $0x118] sm:$0xff]  }
 0x1bf   : > { %1320 = vmatpush1.bf16.msra.mxu1 %v2821_v6  ;;  %v2889_v6 = vld [vmem:[#allocation7 + $0xf8] sm:$0xff]  }
 0x1c0   : > { %1321 = vmatprep.subr.bf16.mxu1 %v2826_v8  ;;  %2557 = vmatprep.subr.bf16.mxu0 %v2889_v6  ;;  %v2891_v8 = vld [vmem:[#allocation7 + $0x40] sm:$0xff]   ;;  %v2913_v6 = vld [vmem:[#allocation7 + $0x158] sm:$0xff]  }
 0x1c1   : > { %2558 = vmatpush3.bf16.msra.mxu0 %v2890_v7  ;;  %v2915_v7 = vld [vmem:[#allocation7 + $0x160] sm:$0xff]  }
 0x1c2   : > { %2565 = vmatprep.subr.bf16.mxu0 %v2891_v8  ;;  %v2916_v8 = vld [vmem:[#allocation7 + $0x120] sm:$0xff]  }
 0x1c3   : > { %1322 = vmatpush1.bf16.msra.mxu1 %v2824_v13 }
 0x1c4   : > { %1557 = vmatprep.subr.bf16.mxu1 %v2829_v14 }
 0x1c6   : > { %1324 = vmatmul.mubr.bf16.vlgmr.msra.gmra.mrb[0].mxu1 %v1116_v25  ;;  %v1641_v25 = vld [vmem:[#allocation4 + $0x8] sm:$0x80] }
 0x1c7   : > { %1558 = vmatpush1.bf16.msra.mxu1 %v2827_v24  ;;  %1589 = vmatprep.mubr.bf16.mxu1 %v1394_v26 }
 0x1c8   : > { %1559 = vmatprep.subr.bf16.mxu1 %v2832_v23 }
 0x1cb   : > { %1560 = vmatpush1.bf16.msra.mxu1 %v2830_v27 }
 0x1cc   : > { %1561 = vmatprep.subr.bf16.mxu1 %v2835_v16 }
 0x1cf   : > { %1562 = vmatpush1.bf16.msra.mxu1 %v2833_v20 }
 0x1d0   : > { %1563 = vmatprep.subr.bf16.mxu1 %v2838_v17  ;;  %v1859_v17 = vshrl.u32 %v1641_v25, 16 }
 0x1d3   : > { %1564 = vmatpush1.bf16.msra.mxu1 %v2836_v22 }
 0x1d4   : > { %1565 = vmatprep.subr.bf16.mxu1 %v2841_v28 }
 0x1d7   : > { %1566 = vmatpush1.bf16.msra.mxu1 %v2839_v29  ;;  %v2894_v29 = vld [vmem:[#allocation7 + $0x8] sm:$0xff]  }
 0x1d8   : > { %1567 = vmatprep.subr.bf16.mxu1 %v2844_v0  ;;  %v1861_v0 = vrot.slane %v1859_v17, 7 }
 0x1db   : > { %1568 = vmatpush1.bf16.msra.mxu1 %v2842_v30  ;;  %v2895_v30 = vld [vmem:[#allocation7 + $0x50] sm:$0xff]  }
 0x1dc   : > { %1569 = vmatprep.subr.bf16.mxu1 %v2847_v31 }
 0x1df   : > { %1570 = vmatpush1.bf16.msra.mxu1 %v2845_v33 }
 0x1e0   : > { %1571 = vmatprep.subr.bf16.mxu1 %v2850_v34  ;;  %v2896_v34 = vld [vmem:[#allocation7 + $0x10] sm:$0xff]  }
 0x1e3   : > { %1572 = vmatpush1.bf16.msra.mxu1 %v2848_v35  ;;  %v2897_v35 = vld [vmem:[#allocation7 + $0x58] sm:$0xff]  }
 0x1e4   : > { %1573 = vmatprep.subr.bf16.mxu1 %v2853_v37  ;;  %v2898_v37 = vld [vmem:[#allocation7 + $0x18] sm:$0xff]  }
 0x1e7   : > { %1574 = vmatpush1.bf16.msra.mxu1 %v2851_v38  ;;  %v2899_v38 = vld [vmem:[#allocation7 + $0x60] sm:$0xff]  }
 0x1e8   : > { %1575 = vmatprep.subr.bf16.mxu1 %v2856_v39  ;;  %v2900_v39 = vld [vmem:[#allocation7 + $0x20] sm:$0xff]  }
 0x1eb   : > { %1576 = vmatpush1.bf16.msra.mxu1 %v2854_v40  ;;  %v2901_v40 = vld [vmem:[#allocation7 + $0x68] sm:$0xff]  }
 0x1ec   : > { %1577 = vmatprep.subr.bf16.mxu1 %v2859_v41  ;;  %v2902_v41 = vld [vmem:[#allocation7 + $0x28] sm:$0xff]  }
 0x1ef   : > { %1578 = vmatpush1.bf16.msra.mxu1 %v2857_v42  ;;  %v2903_v42 = vld [vmem:[#allocation7 + $0x70] sm:$0xff]  }
 0x1f0   : > { %1579 = vmatprep.subr.bf16.mxu1 %v2862_v43 }
 0x1f3   : > { %1580 = vmatpush1.bf16.msra.mxu1 %v2860_v44  ;;  %v1640_v44 = vld [vmem:[#allocation4] sm:$0x80] }
 0x1f4   : > { %1581 = vmatprep.subr.bf16.mxu1 %v2865_v45  ;;  %v2904_v45 = vld [vmem:[#allocation7 + $0x30] sm:$0xff]  }
 0x1f7   : > { %1582 = vmatpush1.bf16.msra.mxu1 %v2863_v46  ;;  %v2012_v46 = vld [vmem:[#allocation4 + $0x28] sm:$0x1] }
 0x1f8   : > { %1583 = vmatprep.subr.bf16.mxu1 %v2868_v47  ;;  %v2905_v47 = vld [vmem:[#allocation7 + $0x78] sm:$0xff]  }
 0x1fb   : > { %1584 = vmatpush1.bf16.msra.mxu1 %v2866_v48 }
 0x1fc   : > { %1585 = vmatprep.subr.bf16.mxu1 %v2871_v49  ;;  %v1847_v49 = vshrl.u32 %v1640_v44, 16 }
 0x1ff   : > { %1586 = vmatpush1.bf16.msra.mxu1 %v2869_v51  ;;  %v2066_v51 = vshll.u32 %v2012_v46, 16 }
 0x200   : > { %1587 = vmatprep.subr.bf16.mxu1 %v2874_v52 }
 0x201   : > { %v2068_v58 = vrot.slane %v2066_v51, 1 }
 0x203   : > { %1588 = vmatpush1.bf16.msra.mxu1 %v2872_v54  ;;  %v2907_v54 = vld [vmem:[#allocation7 + $0x140] sm:$0xff]  }
 0x206   : > { %1590 = vmatmul.mubr.bf16.vlgmr.msra.gmra.mrb[0].mxu1 %v1382_v56  ;;  %v1849_v56 = vrot.slane %v1847_v49, 7 }
 0x2d9   : > { %v1591_v12 = vpop.f32.mrb[0].mxu1 }
 0x2da   : > { %v1616_v36 = vadd.f32 %v1609_v10, %v1591_v12  ;;  %v1593_v13 = vpop.f32.mrb[1].mxu1  ;;  %v2011_v12 = vld [vmem:[#allocation4 + $0x20] sm:$0x1] }
 0x2db   : > { %v1617_v14 = vadd.f32 %v1613_v11, %v1593_v13  ;;  %v1595_v15 = vpop.f32.mrb[2].mxu1  ;;  %v2921_v13 = vld [vmem:[#allocation7 + $0x178] sm:$0xff]  }
 0x2dc   : > { %v1618_v18 = vadd.f32 %v1609_v10, %v1595_v15  ;;  %v1597_v19 = vpop.f32.mrb[3].mxu1  ;;  %v1620_v24 = vmax.f32 %v1616_v36, 0.0  ;;  %v2918_v10 = vld [vmem:[#allocation7 + $0x128] sm:$0xff]   ;;  %v2920_v36 = vld [vmem:[#allocation7 + $0x130] sm:$0xff]   ;;  %v2054_v15 = vshll.u32 %v2011_v12, 16 }
 0x2dd   : > { %v1619_v21 = vadd.f32 %v1613_v11, %v1597_v19  ;;  %v1621_v26 = vmax.f32 %v1617_v14, 0.0  ;;  %v2919_v11 = vld [vmem:[#allocation7 + $0x170] sm:$0xff]  }
 0x2de   : > { %v1622_v23 = vmax.f32 %v1618_v18, 0.0  ;;  %v2922_v18 = vld [vmem:[#allocation7 + $0x138] sm:$0xff]  }
 0x2df   : > { %v1623_v27 = vmax.f32 %v1619_v21, 0.0  ;;  %v2056_v21 = vrot.slane %v2054_v15, 1 }
 0x2e0   : > { %v3381_v16 = vpack.c.bf16 %v1622_v23, %v1620_v24 }
 0x2e1   : > { %v1637_v20 = vpack.c.bf16 %v1623_v27, %v1621_v26 }
 0x2e2   : > { %v1851_v43 = vshrl.u32 %v3381_v16, 16  ;;  %v1854_v52 = vshll.u32 %v3381_v16, 16 }
 0x2e3   : > { %1837 = vmatprep.mubr.bf16.mxu0 %v1637_v20  ;;  %v1863_v63 = vshrl.u32 %v1637_v20, 16  ;;  %v1866_v28 = vshll.u32 %v1637_v20, 16 }
 0x2e4   : > { %1838 = vmatmul.mubr.bf16.vlgmr.msra.gmra.mrb[4].mxu0 %v3381_v16  ;;  %v1853_v48 = vrot.slane %v1851_v43, 7  ;;  %v2051_v14 = vrot.slane %v1854_v52, 1 }
 0x2e5   : > { %v1865_v22 = vrot.slane %v1863_v63, 7  ;;  %2566 = vmatpush3.bf16.msra.mxu0 %v2892_v61  ;;  %v2063_v50 = vrot.slane %v1866_v28, 1 }
 0x2e6   : > { %2567 = vmatprep.subr.bf16.mxu0 %v2893_v60  ;;  %v1856_v55 = vor.u32 %v1854_v52, %v1853_v48  ;;  %v2052_v19 = vor.u32 %v2051_v14, %v1851_v43 }
 0x2e7   : > { %v1868_v31 = vor.u32 %v1866_v28, %v1865_v22  ;;  %v2064_v57 = vor.u32 %v2063_v50, %v1863_v63 }
 0x2e8   : > { %v1857_v1 = vsel %vm319_vm7, %v1849_v56, %v1856_v55  ;;  %v2057_v24 = vsel %vm652_vm14, %v2052_v19, %v2056_v21 }
 0x2e9   : > { %2568 = vmatpush3.bf16.msra.mxu0 %v2894_v29  ;;  %v1869_v33 = vsel %vm319_vm7, %v1861_v0, %v1868_v31  ;;  %v2069_v2 = vsel %vm652_vm14, %v2064_v57, %v2068_v58 }
 0x2ea   : > { %2000 = vmatprep.mubr.bf16.mxu0 %v1869_v33  ;;  %2569 = vmatprep.subr.bf16.mxu0 %v2895_v30 }
 0x2ed   : > { %2570 = vmatpush3.bf16.msra.mxu0 %v2896_v34 }
 0x2ee   : > { %2571 = vmatprep.subr.bf16.mxu0 %v2897_v35  ;;  %v2538_v35 = vld [vmem:[%s3407_s6] ss:$0 sm:$0xff] }
 0x2f1   : > { %2572 = vmatpush3.bf16.msra.mxu0 %v2898_v37 }
 0x2f2   : > { %2573 = vmatprep.subr.bf16.mxu0 %v2899_v38 }
 0x2f5   : > { %2574 = vmatpush3.bf16.msra.mxu0 %v2900_v39 }
 0x2f6   : > { %2575 = vmatprep.subr.bf16.mxu0 %v2901_v40 }
 0x2f9   : > { %2576 = vmatpush3.bf16.msra.mxu0 %v2902_v41 }
 0x2fa   : > { %2577 = vmatprep.subr.bf16.mxu0 %v2903_v42 }
 0x2fd   : > { %2578 = vmatpush3.bf16.msra.mxu0 %v2904_v45 }
 0x2fe   : > { %2579 = vmatprep.subr.bf16.mxu0 %v2905_v47 }
 0x301   : > { %2580 = vmatpush3.bf16.msra.mxu0 %v2906_v53 }
 0x302   : > { %2587 = vmatprep.subr.bf16.mxu0 %v2907_v54 }
 0x304   : > { %2001 = vmatmul.mubr.bf16.vlgmr.msra.gmra.mrb[8].mxu0 %v1857_v1 }
 0x305   : > { %2588 = vmatpush3.bf16.msra.mxu0 %v2908_v59  ;;  %2200 = vmatprep.mubr.bf16.mxu0 %v2069_v2 }
 0x306   : > { %2589 = vmatprep.subr.bf16.mxu0 %v2909_v62 }
 0x309   : > { %2590 = vmatpush3.bf16.msra.mxu0 %v2910_v3 }
 0x30a   : > { %2591 = vmatprep.subr.bf16.mxu0 %v2911_v4 }
 0x30d   : > { %2592 = vmatpush3.bf16.msra.mxu0 %v2912_v5 }
 0x30e   : > { %2593 = vmatprep.subr.bf16.mxu0 %v2913_v6 }
 0x311   : > { %2594 = vmatpush3.bf16.msra.mxu0 %v2914_v32 }
 0x312   : > { %2595 = vmatprep.subr.bf16.mxu0 %v2915_v7 }
 0x315   : > { %2596 = vmatpush3.bf16.msra.mxu0 %v2916_v8 }
 0x316   : > { %2597 = vmatprep.subr.bf16.mxu0 %v2917_v9 }
 0x319   : > { %2598 = vmatpush3.bf16.msra.mxu0 %v2918_v10 }
 0x31a   : > { %2599 = vmatprep.subr.bf16.mxu0 %v2919_v11 }
 0x31d   : > { %2600 = vmatpush3.bf16.msra.mxu0 %v2920_v36 }
 0x31e   : > { %2601 = vmatprep.subr.bf16.mxu0 %v2921_v13 }
 0x321   : > { %2602 = vmatpush3.bf16.msra.mxu0 %v2922_v18 }
 0x324   : > { %2201 = vmatmul.mubr.bf16.vlgmr.msra.gmra.mrb[12].mxu0 %v2057_v24 }
 0x3b7   : > { %v2559_v23 = vpop.f32.mrb[4].mxu0 }
 0x3b8   : > { %v2560_v25 = vpop.f32.mrb[5].mxu0 }
 0x3b9   : > { %v2561_v26 = vadd.f32 %v2560_v25, %v2559_v23  ;;  %v2562_v27 = vpop.f32.mrb[6].mxu0 }
 0x3ba   : > { %v2563_v16 = vpop.f32.mrb[7].mxu0 }
 0x3bb   : > { %v2564_v20 = vadd.f32 %v2563_v16, %v2562_v27 }
 0x3d7   : > { %v2581_v61 = vpop.f32.mrb[8].mxu0 }
 0x3d8   : > { %v2582_v17 = vpop.f32.mrb[9].mxu0 }
 0x3d9   : > { %v2583_v60 = vadd.f32 %v2582_v17, %v2581_v61  ;;  %v2584_v63 = vpop.f32.mrb[10].mxu0 }
 0x3da   : > { %v2585_v22 = vpop.f32.mrb[11].mxu0 }
 0x3db   : > { %v2003_v28 = vadd.f32 %v2583_v60, %v2561_v26  ;;  %v2586_v29 = vadd.f32 %v2585_v22, %v2584_v63 }
 0x3dd   : > { %v2006_v0 = vadd.f32 %v2586_v29, %v2564_v20 }
 0x3f7   : > { %v2603_v30 = vpop.f32.mrb[12].mxu0 }
 0x3f8   : > { %v2604_v31 = vpop.f32.mrb[13].mxu0 }
 0x3f9   : > { %v2605_v33 = vadd.f32 %v2604_v31, %v2603_v30  ;;  %v2606_v34 = vpop.f32.mrb[14].mxu0 }
 0x3fa   : > { %v2607_v37 = vpop.f32.mrb[15].mxu0 }
 0x3fb   : > { %v2209_v38 = vadd.f32 %v2605_v33, %v2003_v28  ;;  %v2608_v39 = vadd.f32 %v2607_v37, %v2606_v34 }
 0x3fd   : > { %v2218_v40 = vadd.f32 %v2538_v35, %v2209_v38  ;;  %v2210_v41 = vadd.f32 %v2608_v39, %v2006_v0 }
 0x3ff   : > { %v2220_v42 = vmax.f32 %v2218_v40, 0.0  ;;  %v2219_v43 = vadd.f32 %v2538_v35, %v2210_v41 }
 0x401   : > { %2222 = vst [vmem:[%s308_s19] sm:$0xff] %v2220_v42  ;;  %v2221_v44 = vmax.f32 %v2219_v43, 0.0 }
 0x403   : > { %2223 = vst [vmem:[%s308_s19 + $0x8] sm:$0xff] %v2221_v44 }
 0x404 PF: > { %s19_s24 = sadd.s32 1, %s2993_s24  }
 0x405   : > { %p16_p9 = scmp.ge.s32.totalorder %s19_s24, 4  }
 0x407   :  { %18 = sbr.rel (!%p16_p9) target bundleno = 2 (0x2), region = 93 }
 0x40e   :  { %2245 = vsyncpa [#allocation6], 1 }
 0x40f   :  { %2247 = vsyncpa [#allocation6 + $0x1], 1 }
 0x410   :  { %2248 = vsyncpa [#allocation8], 1 }

</bundles_post_ra>
